<compile_context>
chip_gen: v7x
topology: tpu7x:2x2x1
jax: 0.10.0
libtpu: 0.0.40
codegen_flags: <defaults>
</compile_context>

<pallas_src>
import functools

import numpy as np
import jax
import jax.numpy as jnp
from jax import lax
from jax.experimental import pallas as pl
from jax.experimental.pallas import tpu as pltpu

D = 3          # number of groups
NBINS = 10     # discretization (number of histogram bins)
MAX_TN = 8192  # max samples per grid step (amortizes ~0.35us/step pipeline overhead)
CHUNK = 1024   # lanes processed per unrolled inner iteration (bounds vreg pressure)


def _round_up(x, m):
    return ((x + m - 1) // m) * m


# ---------------------------------------------------------------------------
# Fused kernel: soft-histogram accumulation over sample tiles + d-EMD epilogue.
# ---------------------------------------------------------------------------
def _demd_fused_kernel(acts_ref, labels_ref, obj_ref, hist_ref, *,
                       num_groups, nbins, n_samples, chunk):
    # acts_ref:   (1, TN)              f32 activations tile (samples on lanes)
    # labels_ref: (1, TN)              int group-label tile
    # obj_ref:    (1, 1)               f32 output (written on last grid step)
    # hist_ref:   (NBINS_PAD, D_PAD)   f32 VMEM accumulator (bins x groups),
    #                                  resident across the whole grid
    nbins_pad, d_pad = hist_ref.shape
    tn = acts_ref.shape[1]
    n_chunks = tn // chunk
    step = pl.program_id(0)

    @pl.when(step == 0)
    def _():
        hist_ref[...] = jnp.zeros_like(hist_ref)

    r = 1.0 / nbins
    # Bin centers on sublanes: (NBINS_PAD, 1).  Padded bin rows get a far-away center
    # so their triangular-kernel response is exactly 0.
    brow = lax.broadcasted_iota(jnp.int32, (nbins_pad, 1), 0)
    locs = jnp.where(brow < nbins, brow.astype(jnp.float32) * r, 1e9)

    # Hoisted (JAX does not CSE broadcasts): lane index within a chunk.
    lane = lax.broadcasted_iota(jnp.int32, (1, chunk), 1)
    base = step * tn  # global index of the first sample of this tile

    # Fully-unrolled static chunk loop: every slice start is a compile-time constant,
    # so all loads are static lane-aligned slices of the (1, TN) VMEM tile.
    for c in range(n_chunks):
        c0 = c * chunk
        a = acts_ref[:, c0:c0 + chunk]            # (1, CHUNK) f32
        lab = labels_ref[:, c0:c0 + chunk]        # (1, CHUNK) int
        # Tail masking by GLOBAL SAMPLE INDEX (never by label contents: the overhang
        # of the last partial block is stale VMEM and could equal a valid group id).
        valid = (base + c0 + lane) < n_samples    # (1, CHUNK) bool
        cdf = jax.nn.sigmoid(a) - 0.0001          # (1, CHUNK)
        # Triangular soft-binning kernel, lane-dense: (NBINS_PAD, CHUNK).
        k_t = jnp.maximum(r - jnp.abs(cdf - locs), 0.0)
        # Per-group masked lane reductions (D is tiny); avoids the RHS-transposed
        # dot_general whose lowering could insert an XLU transpose of a wide operand.
        for g in range(num_groups):
            m = jnp.logical_and(lab == g, valid)                       # (1, CHUNK)
            partial = jnp.sum(jnp.where(m, k_t, 0.0),
                              axis=1, keepdims=True)                   # (NBINS_PAD, 1)
            hist_ref[:, g:g + 1] += partial

    @pl.when(step == pl.num_programs(0) - 1)
    def _():
        counts = hist_ref[...]                                         # (NBP, DP)
        row = lax.broadcasted_iota(jnp.int32, (nbins_pad, d_pad), 0)
        col = lax.broadcasted_iota(jnp.int32, (nbins_pad, d_pad), 1)
        # HistoBin.norm: +1e-4 on real bins only, then per-group normalize.
        h = counts + jnp.where(row < nbins, 0.0001, 0.0)
        h = h / jnp.sum(h, axis=0, keepdims=True)
        # (genHists' second normalize divides by an exact 1.0 -> dropped.)

        # Per-group CDFs via a tiny lower-triangular matmul (MXU-natural orientation):
        #   F[k, g] = sum_{j <= k} h[j, g]
        ti = lax.broadcasted_iota(jnp.int32, (nbins_pad, nbins_pad), 0)
        tj = lax.broadcasted_iota(jnp.int32, (nbins_pad, nbins_pad), 1)
        tri = (tj <= ti).astype(jnp.float32)
        cdfs = jnp.dot(tri, h, preferred_element_type=jnp.float32)     # (NBP, DP)

        # Greedy d-EMD with OBJ(idx)=max-min  ==  sum_{k<nbins-1} (max_g F - min_g F).
        # Padded-group lanes are masked out of the max/min.
        gmask = col < num_groups
        fmax = jnp.max(jnp.where(gmask, cdfs, -jnp.inf), axis=1, keepdims=True)
        fmin = jnp.min(jnp.where(gmask, cdfs, jnp.inf), axis=1, keepdims=True)
        diff = jnp.where(brow < nbins - 1, fmax - fmin, 0.0)           # (NBP, 1)
        obj_ref[...] = jnp.sum(diff, axis=(0, 1), keepdims=True)


# ---------------------------------------------------------------------------
# Wrapper
# ---------------------------------------------------------------------------
def demd_layer(acts, group_labels, num_groups=D, nbins=NBINS,
               max_tn=MAX_TN, chunk=CHUNK):
    n = int(acts.shape[0])
    tn = min(max_tn, _round_up(n, chunk))      # one grid step for typical small n
    grid = pl.cdiv(n, tn)
    nbins_pad = _round_up(nbins, 8)
    d_pad = _round_up(num_groups, 8)

    # No materialized padded copies: reshape to (1, n) is metadata-only; n is baked
    # statically into the kernel which masks the last block's overhang by index.
    acts2 = acts.astype(jnp.float32).reshape(1, n)
    labels2 = group_labels.reshape(1, n)       # any integer dtype (int8 saves HBM)

    kernel = functools.partial(_demd_fused_kernel, num_groups=num_groups,
                               nbins=nbins, n_samples=n, chunk=chunk)

    obj = pl.pallas_call(
        kernel,
        out_shape=jax.ShapeDtypeStruct((1, 1), jnp.float32),
        grid_spec=pltpu.PrefetchScalarGridSpec(
            num_scalar_prefetch=0,
            grid=(grid,),
            in_specs=[
                pl.BlockSpec((1, tn), lambda i: (0, i)),   # acts tile
                pl.BlockSpec((1, tn), lambda i: (0, i)),   # labels tile
            ],
            out_specs=pl.BlockSpec((1, 1), lambda i: (0, 0)),
            scratch_shapes=[pltpu.VMEM((nbins_pad, d_pad), jnp.float32)],
        ),
        compiler_params=pltpu.CompilerParams(
            dimension_semantics=("arbitrary",)),
    )(acts2, labels2)
    return obj[0, 0]


# ---------------------------------------------------------------------------
# Pure numpy reference (mirrors the PyTorch module forward, literal greedy loop).
# ---------------------------------------------------------------------------
def demd_ref(acts, labels, num_groups=D, nbins=NBINS):
    acts = np.asarray(acts, np.float32)
    labels = np.asarray(labels)
    r = 1.0 / nbins
    locs = np.arange(nbins, dtype=np.float32) / nbins
    dists = []
    for g in range(num_groups):
        x = acts[labels == g]
        cdf = 1.0 / (1.0 + np.exp(-x)) - 0.0001
        counts = np.maximum(r - np.abs(cdf[:, None] - locs[None, :]), 0.0).sum(0)
        h = counts + 0.0001
        h = h / h.sum()
        h = h / h.sum()
        dists.append(h)
    A = np.stack(dists).astype(np.float32)
    d, n = A.shape
    idx = [0] * d
    obj = 0.0
    while all(i < n for i in idx):
        vals = [A[i, j] for i, j in zip(range(d), idx)]
        minval = min(vals)
        ind = vals.index(minval)
        obj += float(minval) * (max(idx) - min(idx))   # OBJ(idx) = max - min
        for i, j in zip(range(d), idx):
            A[i, j] -= minval
        idx[ind] += 1
    return obj


if __name__ == "__main__":
    key = jax.random.PRNGKey(0)
    k1, k2 = jax.random.split(key)
    N = 5000                                   # exercises tail masking + chunk loop
    acts = jax.random.normal(k1, (N,), dtype=jnp.float32)
    group_labels = jax.random.randint(k2, (N,), 0, D, dtype=jnp.int32)

    ref = demd_ref(np.array(acts), np.array(group_labels))

    # Single-grid-step path (tn = round_up(N, CHUNK) = 5120, grid = 1).
    out = jax.block_until_ready(demd_layer(acts, group_labels))
    assert np.allclose(float(out), ref, rtol=1e-3, atol=1e-4), (float(out), ref)

    # Multi-grid-step path (tn = 2048, grid = 3) to exercise cross-step accumulation.
    out2 = jax.block_until_ready(demd_layer(acts, group_labels, max_tn=2048))
    assert np.allclose(float(out2), ref, rtol=1e-3, atol=1e-4), (float(out2), ref)

    print("KERNEL_OK")
</pallas_src>

<mosaic_0001>
module attributes {stable_mosaic.version = 11 : i64} {
  func.func @_demd_fused_kernel(%arg0: i32, %arg1: memref<1x5120xf32, #tpu.memory_space<vmem>>, %arg2: memref<1x5120xi32, #tpu.memory_space<vmem>>, %arg3: memref<1x1xf32, #tpu.memory_space<vmem>>, %arg4: memref<16x8xf32, #tpu.memory_space<vmem>>) attributes {dimension_semantics = [#tpu.dimension_semantics<arbitrary>], iteration_bounds = array<i64: 1>, scalar_prefetch = 0 : i64, scratch_operands = 1 : i64, tpu.core_type = #tpu.core_type<tc>, window_params = [{transform_indices = @transform_0, window_bounds = array<i64: 1, 5120>}, {transform_indices = @transform_1, window_bounds = array<i64: 1, 5120>}, {pipeline_mode = #tpu.pipeline_mode<synchronous>, transform_indices = @transform_2, window_bounds = array<i64: 1, 1>}]} {
    %c0_i32 = arith.constant 0 : i32
    %0 = arith.cmpi eq, %arg0, %c0_i32 : i32
    %1 = arith.extui %0 : i1 to i32
    %c0_i32_0 = arith.constant 0 : i32
    %2 = arith.cmpi ne, %1, %c0_i32_0 : i32
    scf.if %2 {
      %cst_145 = arith.constant 0.000000e+00 : f32
      %306 = vector.broadcast %cst_145 : f32 to vector<16x8xf32>
      %c0_146 = arith.constant 0 : index
      %c0_147 = arith.constant 0 : index
      %307 = vector.load %arg4[%c0_146, %c0_147] : memref<16x8xf32, #tpu.memory_space<vmem>>, vector<16x8xf32>
      tpu.vector_store %arg4[%c0_146, %c0_147], %306 {strides = array<i32>} : memref<16x8xf32, #tpu.memory_space<vmem>>, vector<16x8xf32>,
    } else {
    }
    %3 = tpu.iota {dimensions = array<i32: 0>} : vector<16x1xi32>
    %c10_i32 = arith.constant 10 : i32
    %4 = vector.broadcast %c10_i32 : i32 to vector<16x1xi32>
    %5 = arith.cmpi slt, %3, %4 : vector<16x1xi32>
    %6 = arith.sitofp %3 : vector<16x1xi32> to vector<16x1xf32>
    %cst = arith.constant 1.000000e-01 : f32
    %7 = vector.broadcast %cst : f32 to vector<16x1xf32>
    %8 = arith.mulf %6, %7 : vector<16x1xf32>
    %cst_1 = arith.constant 1.000000e+09 : f32
    %9 = vector.broadcast %cst_1 : f32 to vector<16x1xf32>
    %10 = arith.select %5, %8, %9 : vector<16x1xi1>, vector<16x1xf32>
    %11 = tpu.iota {dimensions = array<i32: 1>} : vector<1x1024xi32>
    %c5120_i32 = arith.constant 5120 : i32
    %12 = arith.muli %arg0, %c5120_i32 : i32
    %c0 = arith.constant 0 : index
    %c0_2 = arith.constant 0 : index
    %13 = vector.load %arg1[%c0, %c0_2] : memref<1x5120xf32, #tpu.memory_space<vmem>>, vector<1x1024xf32>
    %c0_3 = arith.constant 0 : index
    %c0_4 = arith.constant 0 : index
    %14 = vector.load %arg2[%c0_3, %c0_4] : memref<1x5120xi32, #tpu.memory_space<vmem>>, vector<1x1024xi32>
    %c0_i32_5 = arith.constant 0 : i32
    %15 = arith.addi %12, %c0_i32_5 : i32
    %16 = vector.broadcast %15 : i32 to vector<1x1024xi32>
    %17 = arith.addi %16, %11 : vector<1x1024xi32>
    %c5000_i32 = arith.constant 5000 : i32
    %18 = vector.broadcast %c5000_i32 : i32 to vector<1x1024xi32>
    %19 = arith.cmpi slt, %17, %18 : vector<1x1024xi32>
    %20 = arith.negf %13 : vector<1x1024xf32>
    %21 = math.exp %20 : vector<1x1024xf32>
    %cst_6 = arith.constant 1.000000e+00 : f32
    %22 = vector.broadcast %cst_6 : f32 to vector<1x1024xf32>
    %23 = arith.addf %22, %21 : vector<1x1024xf32>
    %24 = arith.divf %22, %23 : vector<1x1024xf32>
    %cst_7 = arith.constant 9.99999974E-5 : f32
    %25 = vector.broadcast %cst_7 : f32 to vector<1x1024xf32>
    %26 = arith.subf %24, %25 : vector<1x1024xf32>
    %27 = vector.broadcast %26 : vector<1x1024xf32> to vector<16x1024xf32>
    %28 = vector.broadcast %10 : vector<16x1xf32> to vector<16x1024xf32>
    %29 = arith.subf %27, %28 : vector<16x1024xf32>
    %30 = math.absf %29 : vector<16x1024xf32>
    %cst_8 = arith.constant 1.000000e-01 : f32
    %31 = vector.broadcast %cst_8 : f32 to vector<16x1024xf32>
    %32 = arith.subf %31, %30 : vector<16x1024xf32>
    %cst_9 = arith.constant 0.000000e+00 : f32
    %33 = vector.broadcast %cst_9 : f32 to vector<16x1024xf32>
    %34 = arith.maximumf %32, %33 : vector<16x1024xf32>
    %c0_i32_10 = arith.constant 0 : i32
    %35 = vector.broadcast %c0_i32_10 : i32 to vector<1x1024xi32>
    %36 = arith.cmpi eq, %14, %35 : vector<1x1024xi32>
    %37 = arith.andi %36, %19 : vector<1x1024xi1>
    %cst_11 = arith.constant 0.000000e+00 : f32
    %38 = vector.shape_cast %37 : vector<1x1024xi1> to vector<1x1024xi1>
    %39 = vector.broadcast %38 : vector<1x1024xi1> to vector<16x1024xi1>
    %40 = vector.broadcast %cst_11 : f32 to vector<16x1024xf32>
    %41 = arith.select %39, %34, %40 : vector<16x1024xi1>, vector<16x1024xf32>
    %cst_12 = arith.constant dense<0.000000e+00> : vector<16xf32>
    %42 = vector.multi_reduction <add>, %41, %cst_12 [1] : vector<16x1024xf32> to vector<16xf32>
    %43 = vector.shape_cast %42 : vector<16xf32> to vector<16x1xf32>
    %c0_13 = arith.constant 0 : index
    %c0_14 = arith.constant 0 : index
    %44 = vector.load %arg4[%c0_13, %c0_14] : memref<16x8xf32, #tpu.memory_space<vmem>>, vector<16x1xf32>
    %45 = arith.addf %44, %43 : vector<16x1xf32>
    %c0_15 = arith.constant 0 : index
    %c0_16 = arith.constant 0 : index
    %46 = vector.load %arg4[%c0_15, %c0_16] : memref<16x8xf32, #tpu.memory_space<vmem>>, vector<16x1xf32>
    tpu.vector_store %arg4[%c0_15, %c0_16], %45 {strides = array<i32>} : memref<16x8xf32, #tpu.memory_space<vmem>>, vector<16x1xf32>,
    %c1_i32 = arith.constant 1 : i32
    %47 = vector.broadcast %c1_i32 : i32 to vector<1x1024xi32>
    %48 = arith.cmpi eq, %14, %47 : vector<1x1024xi32>
    %49 = arith.andi %48, %19 : vector<1x1024xi1>
    %cst_17 = arith.constant 0.000000e+00 : f32
    %50 = vector.shape_cast %49 : vector<1x1024xi1> to vector<1x1024xi1>
    %51 = vector.broadcast %50 : vector<1x1024xi1> to vector<16x1024xi1>
    %52 = vector.broadcast %cst_17 : f32 to vector<16x1024xf32>
    %53 = arith.select %51, %34, %52 : vector<16x1024xi1>, vector<16x1024xf32>
    %cst_18 = arith.constant dense<0.000000e+00> : vector<16xf32>
    %54 = vector.multi_reduction <add>, %53, %cst_18 [1] : vector<16x1024xf32> to vector<16xf32>
    %55 = vector.shape_cast %54 : vector<16xf32> to vector<16x1xf32>
    %c0_19 = arith.constant 0 : index
    %c1 = arith.constant 1 : index
    %56 = vector.load %arg4[%c0_19, %c1] : memref<16x8xf32, #tpu.memory_space<vmem>>, vector<16x1xf32>
    %57 = arith.addf %56, %55 : vector<16x1xf32>
    %c0_20 = arith.constant 0 : index
    %c1_21 = arith.constant 1 : index
    %58 = vector.load %arg4[%c0_20, %c1_21] : memref<16x8xf32, #tpu.memory_space<vmem>>, vector<16x1xf32>
    tpu.vector_store %arg4[%c0_20, %c1_21], %57 {strides = array<i32>} : memref<16x8xf32, #tpu.memory_space<vmem>>, vector<16x1xf32>,
    %c2_i32 = arith.constant 2 : i32
    %59 = vector.broadcast %c2_i32 : i32 to vector<1x1024xi32>
    %60 = arith.cmpi eq, %14, %59 : vector<1x1024xi32>
    %61 = arith.andi %60, %19 : vector<1x1024xi1>
    %cst_22 = arith.constant 0.000000e+00 : f32
    %62 = vector.shape_cast %61 : vector<1x1024xi1> to vector<1x1024xi1>
    %63 = vector.broadcast %62 : vector<1x1024xi1> to vector<16x1024xi1>
    %64 = vector.broadcast %cst_22 : f32 to vector<16x1024xf32>
    %65 = arith.select %63, %34, %64 : vector<16x1024xi1>, vector<16x1024xf32>
    %cst_23 = arith.constant dense<0.000000e+00> : vector<16xf32>
    %66 = vector.multi_reduction <add>, %65, %cst_23 [1] : vector<16x1024xf32> to vector<16xf32>
    %67 = vector.shape_cast %66 : vector<16xf32> to vector<16x1xf32>
    %c0_24 = arith.constant 0 : index
    %c2 = arith.constant 2 : index
    %68 = vector.load %arg4[%c0_24, %c2] : memref<16x8xf32, #tpu.memory_space<vmem>>, vector<16x1xf32>
    %69 = arith.addf %68, %67 : vector<16x1xf32>
    %c0_25 = arith.constant 0 : index
    %c2_26 = arith.constant 2 : index
    %70 = vector.load %arg4[%c0_25, %c2_26] : memref<16x8xf32, #tpu.memory_space<vmem>>, vector<16x1xf32>
    tpu.vector_store %arg4[%c0_25, %c2_26], %69 {strides = array<i32>} : memref<16x8xf32, #tpu.memory_space<vmem>>, vector<16x1xf32>,
    %c0_27 = arith.constant 0 : index
    %c1024 = arith.constant 1024 : index
    %71 = vector.load %arg1[%c0_27, %c1024] : memref<1x5120xf32, #tpu.memory_space<vmem>>, vector<1x1024xf32>
    %c0_28 = arith.constant 0 : index
    %c1024_29 = arith.constant 1024 : index
    %72 = vector.load %arg2[%c0_28, %c1024_29] : memref<1x5120xi32, #tpu.memory_space<vmem>>, vector<1x1024xi32>
    %c1024_i32 = arith.constant 1024 : i32
    %73 = arith.addi %12, %c1024_i32 : i32
    %74 = vector.broadcast %73 : i32 to vector<1x1024xi32>
    %75 = arith.addi %74, %11 : vector<1x1024xi32>
    %c5000_i32_30 = arith.constant 5000 : i32
    %76 = vector.broadcast %c5000_i32_30 : i32 to vector<1x1024xi32>
    %77 = arith.cmpi slt, %75, %76 : vector<1x1024xi32>
    %78 = arith.negf %71 : vector<1x1024xf32>
    %79 = math.exp %78 : vector<1x1024xf32>
    %cst_31 = arith.constant 1.000000e+00 : f32
    %80 = vector.broadcast %cst_31 : f32 to vector<1x1024xf32>
    %81 = arith.addf %80, %79 : vector<1x1024xf32>
    %82 = arith.divf %80, %81 : vector<1x1024xf32>
    %cst_32 = arith.constant 9.99999974E-5 : f32
    %83 = vector.broadcast %cst_32 : f32 to vector<1x1024xf32>
    %84 = arith.subf %82, %83 : vector<1x1024xf32>
    %85 = vector.broadcast %84 : vector<1x1024xf32> to vector<16x1024xf32>
    %86 = vector.broadcast %10 : vector<16x1xf32> to vector<16x1024xf32>
    %87 = arith.subf %85, %86 : vector<16x1024xf32>
    %88 = math.absf %87 : vector<16x1024xf32>
    %cst_33 = arith.constant 1.000000e-01 : f32
    %89 = vector.broadcast %cst_33 : f32 to vector<16x1024xf32>
    %90 = arith.subf %89, %88 : vector<16x1024xf32>
    %cst_34 = arith.constant 0.000000e+00 : f32
    %91 = vector.broadcast %cst_34 : f32 to vector<16x1024xf32>
    %92 = arith.maximumf %90, %91 : vector<16x1024xf32>
    %c0_i32_35 = arith.constant 0 : i32
    %93 = vector.broadcast %c0_i32_35 : i32 to vector<1x1024xi32>
    %94 = arith.cmpi eq, %72, %93 : vector<1x1024xi32>
    %95 = arith.andi %94, %77 : vector<1x1024xi1>
    %cst_36 = arith.constant 0.000000e+00 : f32
    %96 = vector.shape_cast %95 : vector<1x1024xi1> to vector<1x1024xi1>
    %97 = vector.broadcast %96 : vector<1x1024xi1> to vector<16x1024xi1>
    %98 = vector.broadcast %cst_36 : f32 to vector<16x1024xf32>
    %99 = arith.select %97, %92, %98 : vector<16x1024xi1>, vector<16x1024xf32>
    %cst_37 = arith.constant dense<0.000000e+00> : vector<16xf32>
    %100 = vector.multi_reduction <add>, %99, %cst_37 [1] : vector<16x1024xf32> to vector<16xf32>
    %101 = vector.shape_cast %100 : vector<16xf32> to vector<16x1xf32>
    %c0_38 = arith.constant 0 : index
    %c0_39 = arith.constant 0 : index
    %102 = vector.load %arg4[%c0_38, %c0_39] : memref<16x8xf32, #tpu.memory_space<vmem>>, vector<16x1xf32>
    %103 = arith.addf %102, %101 : vector<16x1xf32>
    %c0_40 = arith.constant 0 : index
    %c0_41 = arith.constant 0 : index
    %104 = vector.load %arg4[%c0_40, %c0_41] : memref<16x8xf32, #tpu.memory_space<vmem>>, vector<16x1xf32>
    tpu.vector_store %arg4[%c0_40, %c0_41], %103 {strides = array<i32>} : memref<16x8xf32, #tpu.memory_space<vmem>>, vector<16x1xf32>,
    %c1_i32_42 = arith.constant 1 : i32
    %105 = vector.broadcast %c1_i32_42 : i32 to vector<1x1024xi32>
    %106 = arith.cmpi eq, %72, %105 : vector<1x1024xi32>
    %107 = arith.andi %106, %77 : vector<1x1024xi1>
    %cst_43 = arith.constant 0.000000e+00 : f32
    %108 = vector.shape_cast %107 : vector<1x1024xi1> to vector<1x1024xi1>
    %109 = vector.broadcast %108 : vector<1x1024xi1> to vector<16x1024xi1>
    %110 = vector.broadcast %cst_43 : f32 to vector<16x1024xf32>
    %111 = arith.select %109, %92, %110 : vector<16x1024xi1>, vector<16x1024xf32>
    %cst_44 = arith.constant dense<0.000000e+00> : vector<16xf32>
    %112 = vector.multi_reduction <add>, %111, %cst_44 [1] : vector<16x1024xf32> to vector<16xf32>
    %113 = vector.shape_cast %112 : vector<16xf32> to vector<16x1xf32>
    %c0_45 = arith.constant 0 : index
    %c1_46 = arith.constant 1 : index
    %114 = vector.load %arg4[%c0_45, %c1_46] : memref<16x8xf32, #tpu.memory_space<vmem>>, vector<16x1xf32>
    %115 = arith.addf %114, %113 : vector<16x1xf32>
    %c0_47 = arith.constant 0 : index
    %c1_48 = arith.constant 1 : index
    %116 = vector.load %arg4[%c0_47, %c1_48] : memref<16x8xf32, #tpu.memory_space<vmem>>, vector<16x1xf32>
    tpu.vector_store %arg4[%c0_47, %c1_48], %115 {strides = array<i32>} : memref<16x8xf32, #tpu.memory_space<vmem>>, vector<16x1xf32>,
    %c2_i32_49 = arith.constant 2 : i32
    %117 = vector.broadcast %c2_i32_49 : i32 to vector<1x1024xi32>
    %118 = arith.cmpi eq, %72, %117 : vector<1x1024xi32>
    %119 = arith.andi %118, %77 : vector<1x1024xi1>
    %cst_50 = arith.constant 0.000000e+00 : f32
    %120 = vector.shape_cast %119 : vector<1x1024xi1> to vector<1x1024xi1>
    %121 = vector.broadcast %120 : vector<1x1024xi1> to vector<16x1024xi1>
    %122 = vector.broadcast %cst_50 : f32 to vector<16x1024xf32>
    %123 = arith.select %121, %92, %122 : vector<16x1024xi1>, vector<16x1024xf32>
    %cst_51 = arith.constant dense<0.000000e+00> : vector<16xf32>
    %124 = vector.multi_reduction <add>, %123, %cst_51 [1] : vector<16x1024xf32> to vector<16xf32>
    %125 = vector.shape_cast %124 : vector<16xf32> to vector<16x1xf32>
    %c0_52 = arith.constant 0 : index
    %c2_53 = arith.constant 2 : index
    %126 = vector.load %arg4[%c0_52, %c2_53] : memref<16x8xf32, #tpu.memory_space<vmem>>, vector<16x1xf32>
    %127 = arith.addf %126, %125 : vector<16x1xf32>
    %c0_54 = arith.constant 0 : index
    %c2_55 = arith.constant 2 : index
    %128 = vector.load %arg4[%c0_54, %c2_55] : memref<16x8xf32, #tpu.memory_space<vmem>>, vector<16x1xf32>
    tpu.vector_store %arg4[%c0_54, %c2_55], %127 {strides = array<i32>} : memref<16x8xf32, #tpu.memory_space<vmem>>, vector<16x1xf32>,
    %c0_56 = arith.constant 0 : index
    %c2048 = arith.constant 2048 : index
    %129 = vector.load %arg1[%c0_56, %c2048] : memref<1x5120xf32, #tpu.memory_space<vmem>>, vector<1x1024xf32>
    %c0_57 = arith.constant 0 : index
    %c2048_58 = arith.constant 2048 : index
    %130 = vector.load %arg2[%c0_57, %c2048_58] : memref<1x5120xi32, #tpu.memory_space<vmem>>, vector<1x1024xi32>
    %c2048_i32 = arith.constant 2048 : i32
    %131 = arith.addi %12, %c2048_i32 : i32
    %132 = vector.broadcast %131 : i32 to vector<1x1024xi32>
    %133 = arith.addi %132, %11 : vector<1x1024xi32>
    %c5000_i32_59 = arith.constant 5000 : i32
    %134 = vector.broadcast %c5000_i32_59 : i32 to vector<1x1024xi32>
    %135 = arith.cmpi slt, %133, %134 : vector<1x1024xi32>
    %136 = arith.negf %129 : vector<1x1024xf32>
    %137 = math.exp %136 : vector<1x1024xf32>
    %cst_60 = arith.constant 1.000000e+00 : f32
    %138 = vector.broadcast %cst_60 : f32 to vector<1x1024xf32>
    %139 = arith.addf %138, %137 : vector<1x1024xf32>
    %140 = arith.divf %138, %139 : vector<1x1024xf32>
    %cst_61 = arith.constant 9.99999974E-5 : f32
    %141 = vector.broadcast %cst_61 : f32 to vector<1x1024xf32>
    %142 = arith.subf %140, %141 : vector<1x1024xf32>
    %143 = vector.broadcast %142 : vector<1x1024xf32> to vector<16x1024xf32>
    %144 = vector.broadcast %10 : vector<16x1xf32> to vector<16x1024xf32>
    %145 = arith.subf %143, %144 : vector<16x1024xf32>
    %146 = math.absf %145 : vector<16x1024xf32>
    %cst_62 = arith.constant 1.000000e-01 : f32
    %147 = vector.broadcast %cst_62 : f32 to vector<16x1024xf32>
    %148 = arith.subf %147, %146 : vector<16x1024xf32>
    %cst_63 = arith.constant 0.000000e+00 : f32
    %149 = vector.broadcast %cst_63 : f32 to vector<16x1024xf32>
    %150 = arith.maximumf %148, %149 : vector<16x1024xf32>
    %c0_i32_64 = arith.constant 0 : i32
    %151 = vector.broadcast %c0_i32_64 : i32 to vector<1x1024xi32>
    %152 = arith.cmpi eq, %130, %151 : vector<1x1024xi32>
    %153 = arith.andi %152, %135 : vector<1x1024xi1>
    %cst_65 = arith.constant 0.000000e+00 : f32
    %154 = vector.shape_cast %153 : vector<1x1024xi1> to vector<1x1024xi1>
    %155 = vector.broadcast %154 : vector<1x1024xi1> to vector<16x1024xi1>
    %156 = vector.broadcast %cst_65 : f32 to vector<16x1024xf32>
    %157 = arith.select %155, %150, %156 : vector<16x1024xi1>, vector<16x1024xf32>
    %cst_66 = arith.constant dense<0.000000e+00> : vector<16xf32>
    %158 = vector.multi_reduction <add>, %157, %cst_66 [1] : vector<16x1024xf32> to vector<16xf32>
    %159 = vector.shape_cast %158 : vector<16xf32> to vector<16x1xf32>
    %c0_67 = arith.constant 0 : index
    %c0_68 = arith.constant 0 : index
    %160 = vector.load %arg4[%c0_67, %c0_68] : memref<16x8xf32, #tpu.memory_space<vmem>>, vector<16x1xf32>
    %161 = arith.addf %160, %159 : vector<16x1xf32>
    %c0_69 = arith.constant 0 : index
    %c0_70 = arith.constant 0 : index
    %162 = vector.load %arg4[%c0_69, %c0_70] : memref<16x8xf32, #tpu.memory_space<vmem>>, vector<16x1xf32>
    tpu.vector_store %arg4[%c0_69, %c0_70], %161 {strides = array<i32>} : memref<16x8xf32, #tpu.memory_space<vmem>>, vector<16x1xf32>,
    %c1_i32_71 = arith.constant 1 : i32
    %163 = vector.broadcast %c1_i32_71 : i32 to vector<1x1024xi32>
    %164 = arith.cmpi eq, %130, %163 : vector<1x1024xi32>
    %165 = arith.andi %164, %135 : vector<1x1024xi1>
    %cst_72 = arith.constant 0.000000e+00 : f32
    %166 = vector.shape_cast %165 : vector<1x1024xi1> to vector<1x1024xi1>
    %167 = vector.broadcast %166 : vector<1x1024xi1> to vector<16x1024xi1>
    %168 = vector.broadcast %cst_72 : f32 to vector<16x1024xf32>
    %169 = arith.select %167, %150, %168 : vector<16x1024xi1>, vector<16x1024xf32>
    %cst_73 = arith.constant dense<0.000000e+00> : vector<16xf32>
    %170 = vector.multi_reduction <add>, %169, %cst_73 [1] : vector<16x1024xf32> to vector<16xf32>
    %171 = vector.shape_cast %170 : vector<16xf32> to vector<16x1xf32>
    %c0_74 = arith.constant 0 : index
    %c1_75 = arith.constant 1 : index
    %172 = vector.load %arg4[%c0_74, %c1_75] : memref<16x8xf32, #tpu.memory_space<vmem>>, vector<16x1xf32>
    %173 = arith.addf %172, %171 : vector<16x1xf32>
    %c0_76 = arith.constant 0 : index
    %c1_77 = arith.constant 1 : index
    %174 = vector.load %arg4[%c0_76, %c1_77] : memref<16x8xf32, #tpu.memory_space<vmem>>, vector<16x1xf32>
    tpu.vector_store %arg4[%c0_76, %c1_77], %173 {strides = array<i32>} : memref<16x8xf32, #tpu.memory_space<vmem>>, vector<16x1xf32>,
    %c2_i32_78 = arith.constant 2 : i32
    %175 = vector.broadcast %c2_i32_78 : i32 to vector<1x1024xi32>
    %176 = arith.cmpi eq, %130, %175 : vector<1x1024xi32>
    %177 = arith.andi %176, %135 : vector<1x1024xi1>
    %cst_79 = arith.constant 0.000000e+00 : f32
    %178 = vector.shape_cast %177 : vector<1x1024xi1> to vector<1x1024xi1>
    %179 = vector.broadcast %178 : vector<1x1024xi1> to vector<16x1024xi1>
    %180 = vector.broadcast %cst_79 : f32 to vector<16x1024xf32>
    %181 = arith.select %179, %150, %180 : vector<16x1024xi1>, vector<16x1024xf32>
    %cst_80 = arith.constant dense<0.000000e+00> : vector<16xf32>
    %182 = vector.multi_reduction <add>, %181, %cst_80 [1] : vector<16x1024xf32> to vector<16xf32>
    %183 = vector.shape_cast %182 : vector<16xf32> to vector<16x1xf32>
    %c0_81 = arith.constant 0 : index
    %c2_82 = arith.constant 2 : index
    %184 = vector.load %arg4[%c0_81, %c2_82] : memref<16x8xf32, #tpu.memory_space<vmem>>, vector<16x1xf32>
    %185 = arith.addf %184, %183 : vector<16x1xf32>
    %c0_83 = arith.constant 0 : index
    %c2_84 = arith.constant 2 : index
    %186 = vector.load %arg4[%c0_83, %c2_84] : memref<16x8xf32, #tpu.memory_space<vmem>>, vector<16x1xf32>
    tpu.vector_store %arg4[%c0_83, %c2_84], %185 {strides = array<i32>} : memref<16x8xf32, #tpu.memory_space<vmem>>, vector<16x1xf32>,
    %c0_85 = arith.constant 0 : index
    %c3072 = arith.constant 3072 : index
    %187 = vector.load %arg1[%c0_85, %c3072] : memref<1x5120xf32, #tpu.memory_space<vmem>>, vector<1x1024xf32>
    %c0_86 = arith.constant 0 : index
    %c3072_87 = arith.constant 3072 : index
    %188 = vector.load %arg2[%c0_86, %c3072_87] : memref<1x5120xi32, #tpu.memory_space<vmem>>, vector<1x1024xi32>
    %c3072_i32 = arith.constant 3072 : i32
    %189 = arith.addi %12, %c3072_i32 : i32
    %190 = vector.broadcast %189 : i32 to vector<1x1024xi32>
    %191 = arith.addi %190, %11 : vector<1x1024xi32>
    %c5000_i32_88 = arith.constant 5000 : i32
    %192 = vector.broadcast %c5000_i32_88 : i32 to vector<1x1024xi32>
    %193 = arith.cmpi slt, %191, %192 : vector<1x1024xi32>
    %194 = arith.negf %187 : vector<1x1024xf32>
    %195 = math.exp %194 : vector<1x1024xf32>
    %cst_89 = arith.constant 1.000000e+00 : f32
    %196 = vector.broadcast %cst_89 : f32 to vector<1x1024xf32>
    %197 = arith.addf %196, %195 : vector<1x1024xf32>
    %198 = arith.divf %196, %197 : vector<1x1024xf32>
    %cst_90 = arith.constant 9.99999974E-5 : f32
    %199 = vector.broadcast %cst_90 : f32 to vector<1x1024xf32>
    %200 = arith.subf %198, %199 : vector<1x1024xf32>
    %201 = vector.broadcast %200 : vector<1x1024xf32> to vector<16x1024xf32>
    %202 = vector.broadcast %10 : vector<16x1xf32> to vector<16x1024xf32>
    %203 = arith.subf %201, %202 : vector<16x1024xf32>
    %204 = math.absf %203 : vector<16x1024xf32>
    %cst_91 = arith.constant 1.000000e-01 : f32
    %205 = vector.broadcast %cst_91 : f32 to vector<16x1024xf32>
    %206 = arith.subf %205, %204 : vector<16x1024xf32>
    %cst_92 = arith.constant 0.000000e+00 : f32
    %207 = vector.broadcast %cst_92 : f32 to vector<16x1024xf32>
    %208 = arith.maximumf %206, %207 : vector<16x1024xf32>
    %c0_i32_93 = arith.constant 0 : i32
    %209 = vector.broadcast %c0_i32_93 : i32 to vector<1x1024xi32>
    %210 = arith.cmpi eq, %188, %209 : vector<1x1024xi32>
    %211 = arith.andi %210, %193 : vector<1x1024xi1>
    %cst_94 = arith.constant 0.000000e+00 : f32
    %212 = vector.shape_cast %211 : vector<1x1024xi1> to vector<1x1024xi1>
    %213 = vector.broadcast %212 : vector<1x1024xi1> to vector<16x1024xi1>
    %214 = vector.broadcast %cst_94 : f32 to vector<16x1024xf32>
    %215 = arith.select %213, %208, %214 : vector<16x1024xi1>, vector<16x1024xf32>
    %cst_95 = arith.constant dense<0.000000e+00> : vector<16xf32>
    %216 = vector.multi_reduction <add>, %215, %cst_95 [1] : vector<16x1024xf32> to vector<16xf32>
    %217 = vector.shape_cast %216 : vector<16xf32> to vector<16x1xf32>
    %c0_96 = arith.constant 0 : index
    %c0_97 = arith.constant 0 : index
    %218 = vector.load %arg4[%c0_96, %c0_97] : memref<16x8xf32, #tpu.memory_space<vmem>>, vector<16x1xf32>
    %219 = arith.addf %218, %217 : vector<16x1xf32>
    %c0_98 = arith.constant 0 : index
    %c0_99 = arith.constant 0 : index
    %220 = vector.load %arg4[%c0_98, %c0_99] : memref<16x8xf32, #tpu.memory_space<vmem>>, vector<16x1xf32>
    tpu.vector_store %arg4[%c0_98, %c0_99], %219 {strides = array<i32>} : memref<16x8xf32, #tpu.memory_space<vmem>>, vector<16x1xf32>,
    %c1_i32_100 = arith.constant 1 : i32
    %221 = vector.broadcast %c1_i32_100 : i32 to vector<1x1024xi32>
    %222 = arith.cmpi eq, %188, %221 : vector<1x1024xi32>
    %223 = arith.andi %222, %193 : vector<1x1024xi1>
    %cst_101 = arith.constant 0.000000e+00 : f32
    %224 = vector.shape_cast %223 : vector<1x1024xi1> to vector<1x1024xi1>
    %225 = vector.broadcast %224 : vector<1x1024xi1> to vector<16x1024xi1>
    %226 = vector.broadcast %cst_101 : f32 to vector<16x1024xf32>
    %227 = arith.select %225, %208, %226 : vector<16x1024xi1>, vector<16x1024xf32>
    %cst_102 = arith.constant dense<0.000000e+00> : vector<16xf32>
    %228 = vector.multi_reduction <add>, %227, %cst_102 [1] : vector<16x1024xf32> to vector<16xf32>
    %229 = vector.shape_cast %228 : vector<16xf32> to vector<16x1xf32>
    %c0_103 = arith.constant 0 : index
    %c1_104 = arith.constant 1 : index
    %230 = vector.load %arg4[%c0_103, %c1_104] : memref<16x8xf32, #tpu.memory_space<vmem>>, vector<16x1xf32>
    %231 = arith.addf %230, %229 : vector<16x1xf32>
    %c0_105 = arith.constant 0 : index
    %c1_106 = arith.constant 1 : index
    %232 = vector.load %arg4[%c0_105, %c1_106] : memref<16x8xf32, #tpu.memory_space<vmem>>, vector<16x1xf32>
    tpu.vector_store %arg4[%c0_105, %c1_106], %231 {strides = array<i32>} : memref<16x8xf32, #tpu.memory_space<vmem>>, vector<16x1xf32>,
    %c2_i32_107 = arith.constant 2 : i32
    %233 = vector.broadcast %c2_i32_107 : i32 to vector<1x1024xi32>
    %234 = arith.cmpi eq, %188, %233 : vector<1x1024xi32>
    %235 = arith.andi %234, %193 : vector<1x1024xi1>
    %cst_108 = arith.constant 0.000000e+00 : f32
    %236 = vector.shape_cast %235 : vector<1x1024xi1> to vector<1x1024xi1>
    %237 = vector.broadcast %236 : vector<1x1024xi1> to vector<16x1024xi1>
    %238 = vector.broadcast %cst_108 : f32 to vector<16x1024xf32>
    %239 = arith.select %237, %208, %238 : vector<16x1024xi1>, vector<16x1024xf32>
    %cst_109 = arith.constant dense<0.000000e+00> : vector<16xf32>
    %240 = vector.multi_reduction <add>, %239, %cst_109 [1] : vector<16x1024xf32> to vector<16xf32>
    %241 = vector.shape_cast %240 : vector<16xf32> to vector<16x1xf32>
    %c0_110 = arith.constant 0 : index
    %c2_111 = arith.constant 2 : index
    %242 = vector.load %arg4[%c0_110, %c2_111] : memref<16x8xf32, #tpu.memory_space<vmem>>, vector<16x1xf32>
    %243 = arith.addf %242, %241 : vector<16x1xf32>
    %c0_112 = arith.constant 0 : index
    %c2_113 = arith.constant 2 : index
    %244 = vector.load %arg4[%c0_112, %c2_113] : memref<16x8xf32, #tpu.memory_space<vmem>>, vector<16x1xf32>
    tpu.vector_store %arg4[%c0_112, %c2_113], %243 {strides = array<i32>} : memref<16x8xf32, #tpu.memory_space<vmem>>, vector<16x1xf32>,
    %c0_114 = arith.constant 0 : index
    %c4096 = arith.constant 4096 : index
    %245 = vector.load %arg1[%c0_114, %c4096] : memref<1x5120xf32, #tpu.memory_space<vmem>>, vector<1x1024xf32>
    %c0_115 = arith.constant 0 : index
    %c4096_116 = arith.constant 4096 : index
    %246 = vector.load %arg2[%c0_115, %c4096_116] : memref<1x5120xi32, #tpu.memory_space<vmem>>, vector<1x1024xi32>
    %c4096_i32 = arith.constant 4096 : i32
    %247 = arith.addi %12, %c4096_i32 : i32
    %248 = vector.broadcast %247 : i32 to vector<1x1024xi32>
    %249 = arith.addi %248, %11 : vector<1x1024xi32>
    %c5000_i32_117 = arith.constant 5000 : i32
    %250 = vector.broadcast %c5000_i32_117 : i32 to vector<1x1024xi32>
    %251 = arith.cmpi slt, %249, %250 : vector<1x1024xi32>
    %252 = arith.negf %245 : vector<1x1024xf32>
    %253 = math.exp %252 : vector<1x1024xf32>
    %cst_118 = arith.constant 1.000000e+00 : f32
    %254 = vector.broadcast %cst_118 : f32 to vector<1x1024xf32>
    %255 = arith.addf %254, %253 : vector<1x1024xf32>
    %256 = arith.divf %254, %255 : vector<1x1024xf32>
    %cst_119 = arith.constant 9.99999974E-5 : f32
    %257 = vector.broadcast %cst_119 : f32 to vector<1x1024xf32>
    %258 = arith.subf %256, %257 : vector<1x1024xf32>
    %259 = vector.broadcast %258 : vector<1x1024xf32> to vector<16x1024xf32>
    %260 = vector.broadcast %10 : vector<16x1xf32> to vector<16x1024xf32>
    %261 = arith.subf %259, %260 : vector<16x1024xf32>
    %262 = math.absf %261 : vector<16x1024xf32>
    %cst_120 = arith.constant 1.000000e-01 : f32
    %263 = vector.broadcast %cst_120 : f32 to vector<16x1024xf32>
    %264 = arith.subf %263, %262 : vector<16x1024xf32>
    %cst_121 = arith.constant 0.000000e+00 : f32
    %265 = vector.broadcast %cst_121 : f32 to vector<16x1024xf32>
    %266 = arith.maximumf %264, %265 : vector<16x1024xf32>
    %c0_i32_122 = arith.constant 0 : i32
    %267 = vector.broadcast %c0_i32_122 : i32 to vector<1x1024xi32>
    %268 = arith.cmpi eq, %246, %267 : vector<1x1024xi32>
    %269 = arith.andi %268, %251 : vector<1x1024xi1>
    %cst_123 = arith.constant 0.000000e+00 : f32
    %270 = vector.shape_cast %269 : vector<1x1024xi1> to vector<1x1024xi1>
    %271 = vector.broadcast %270 : vector<1x1024xi1> to vector<16x1024xi1>
    %272 = vector.broadcast %cst_123 : f32 to vector<16x1024xf32>
    %273 = arith.select %271, %266, %272 : vector<16x1024xi1>, vector<16x1024xf32>
    %cst_124 = arith.constant dense<0.000000e+00> : vector<16xf32>
    %274 = vector.multi_reduction <add>, %273, %cst_124 [1] : vector<16x1024xf32> to vector<16xf32>
    %275 = vector.shape_cast %274 : vector<16xf32> to vector<16x1xf32>
    %c0_125 = arith.constant 0 : index
    %c0_126 = arith.constant 0 : index
    %276 = vector.load %arg4[%c0_125, %c0_126] : memref<16x8xf32, #tpu.memory_space<vmem>>, vector<16x1xf32>
    %277 = arith.addf %276, %275 : vector<16x1xf32>
    %c0_127 = arith.constant 0 : index
    %c0_128 = arith.constant 0 : index
    %278 = vector.load %arg4[%c0_127, %c0_128] : memref<16x8xf32, #tpu.memory_space<vmem>>, vector<16x1xf32>
    tpu.vector_store %arg4[%c0_127, %c0_128], %277 {strides = array<i32>} : memref<16x8xf32, #tpu.memory_space<vmem>>, vector<16x1xf32>,
    %c1_i32_129 = arith.constant 1 : i32
    %279 = vector.broadcast %c1_i32_129 : i32 to vector<1x1024xi32>
    %280 = arith.cmpi eq, %246, %279 : vector<1x1024xi32>
    %281 = arith.andi %280, %251 : vector<1x1024xi1>
    %cst_130 = arith.constant 0.000000e+00 : f32
    %282 = vector.shape_cast %281 : vector<1x1024xi1> to vector<1x1024xi1>
    %283 = vector.broadcast %282 : vector<1x1024xi1> to vector<16x1024xi1>
    %284 = vector.broadcast %cst_130 : f32 to vector<16x1024xf32>
    %285 = arith.select %283, %266, %284 : vector<16x1024xi1>, vector<16x1024xf32>
    %cst_131 = arith.constant dense<0.000000e+00> : vector<16xf32>
    %286 = vector.multi_reduction <add>, %285, %cst_131 [1] : vector<16x1024xf32> to vector<16xf32>
    %287 = vector.shape_cast %286 : vector<16xf32> to vector<16x1xf32>
    %c0_132 = arith.constant 0 : index
    %c1_133 = arith.constant 1 : index
    %288 = vector.load %arg4[%c0_132, %c1_133] : memref<16x8xf32, #tpu.memory_space<vmem>>, vector<16x1xf32>
    %289 = arith.addf %288, %287 : vector<16x1xf32>
    %c0_134 = arith.constant 0 : index
    %c1_135 = arith.constant 1 : index
    %290 = vector.load %arg4[%c0_134, %c1_135] : memref<16x8xf32, #tpu.memory_space<vmem>>, vector<16x1xf32>
    tpu.vector_store %arg4[%c0_134, %c1_135], %289 {strides = array<i32>} : memref<16x8xf32, #tpu.memory_space<vmem>>, vector<16x1xf32>,
    %c2_i32_136 = arith.constant 2 : i32
    %291 = vector.broadcast %c2_i32_136 : i32 to vector<1x1024xi32>
    %292 = arith.cmpi eq, %246, %291 : vector<1x1024xi32>
    %293 = arith.andi %292, %251 : vector<1x1024xi1>
    %cst_137 = arith.constant 0.000000e+00 : f32
    %294 = vector.shape_cast %293 : vector<1x1024xi1> to vector<1x1024xi1>
    %295 = vector.broadcast %294 : vector<1x1024xi1> to vector<16x1024xi1>
    %296 = vector.broadcast %cst_137 : f32 to vector<16x1024xf32>
    %297 = arith.select %295, %266, %296 : vector<16x1024xi1>, vector<16x1024xf32>
    %cst_138 = arith.constant dense<0.000000e+00> : vector<16xf32>
    %298 = vector.multi_reduction <add>, %297, %cst_138 [1] : vector<16x1024xf32> to vector<16xf32>
    %299 = vector.shape_cast %298 : vector<16xf32> to vector<16x1xf32>
    %c0_139 = arith.constant 0 : index
    %c2_140 = arith.constant 2 : index
    %300 = vector.load %arg4[%c0_139, %c2_140] : memref<16x8xf32, #tpu.memory_space<vmem>>, vector<16x1xf32>
    %301 = arith.addf %300, %299 : vector<16x1xf32>
    %c0_141 = arith.constant 0 : index
    %c2_142 = arith.constant 2 : index
    %302 = vector.load %arg4[%c0_141, %c2_142] : memref<16x8xf32, #tpu.memory_space<vmem>>, vector<16x1xf32>
    tpu.vector_store %arg4[%c0_141, %c2_142], %301 {strides = array<i32>} : memref<16x8xf32, #tpu.memory_space<vmem>>, vector<16x1xf32>,
    %c0_i32_143 = arith.constant 0 : i32
    %303 = arith.cmpi eq, %arg0, %c0_i32_143 : i32
    %304 = arith.extui %303 : i1 to i32
    %c0_i32_144 = arith.constant 0 : i32
    %305 = arith.cmpi ne, %304, %c0_i32_144 : i32
    scf.if %305 {
      %c0_145 = arith.constant 0 : index
      %c0_146 = arith.constant 0 : index
      %306 = vector.load %arg4[%c0_145, %c0_146] : memref<16x8xf32, #tpu.memory_space<vmem>>, vector<16x8xf32>
      %307 = tpu.iota {dimensions = array<i32: 0>} : vector<16x8xi32>
      %308 = tpu.iota {dimensions = array<i32: 1>} : vector<16x8xi32>
      %c10_i32_147 = arith.constant 10 : i32
      %309 = vector.broadcast %c10_i32_147 : i32 to vector<16x8xi32>
      %310 = arith.cmpi slt, %307, %309 : vector<16x8xi32>
      %cst_148 = arith.constant 9.99999974E-5 : f32
      %cst_149 = arith.constant 0.000000e+00 : f32
      %311 = vector.broadcast %cst_148 : f32 to vector<16x8xf32>
      %312 = vector.broadcast %cst_149 : f32 to vector<16x8xf32>
      %313 = arith.select %310, %311, %312 : vector<16x8xi1>, vector<16x8xf32>
      %314 = arith.addf %306, %313 : vector<16x8xf32>
      %cst_150 = arith.constant dense<0.000000e+00> : vector<8xf32>
      %315 = vector.multi_reduction <add>, %314, %cst_150 [0] : vector<16x8xf32> to vector<8xf32>
      %316 = vector.shape_cast %315 : vector<8xf32> to vector<1x8xf32>
      %317 = vector.broadcast %316 : vector<1x8xf32> to vector<16x8xf32>
      %318 = arith.divf %314, %317 : vector<16x8xf32>
      %319 = tpu.iota {dimensions = array<i32: 0>} : vector<16x16xi32>
      %320 = tpu.iota {dimensions = array<i32: 1>} : vector<16x16xi32>
      %321 = arith.cmpi sle, %320, %319 : vector<16x16xi32>
      %322 = arith.extui %321 : vector<16x16xi1> to vector<16x16xi32>
      %323 = arith.sitofp %322 : vector<16x16xi32> to vector<16x16xf32>
      %cst_151 = arith.constant dense<0.000000e+00> : vector<16x8xf32>
      %324 = tpu.matmul %323, %318, %cst_151 {dimension_numbers = #tpu.dot_dimension_numbers<[1], [0], [0], [1], [0, 0, 1, 1], [], []>} : vector<16x16xf32>, vector<16x8xf32>, vector<16x8xf32> -> vector<16x8xf32>
      %c3_i32 = arith.constant 3 : i32
      %325 = vector.broadcast %c3_i32 : i32 to vector<16x8xi32>
      %326 = arith.cmpi slt, %308, %325 : vector<16x8xi32>
      %cst_152 = arith.constant 0xFF800000 : f32
      %327 = vector.broadcast %cst_152 : f32 to vector<16x8xf32>
      %328 = arith.select %326, %324, %327 : vector<16x8xi1>, vector<16x8xf32>
      %cst_153 = arith.constant dense<0xFF800000> : vector<16xf32>
      %329 = vector.multi_reduction <maximumf>, %328, %cst_153 [1] : vector<16x8xf32> to vector<16xf32>
      %330 = vector.shape_cast %329 : vector<16xf32> to vector<16x1xf32>
      %cst_154 = arith.constant 0x7F800000 : f32
      %331 = vector.broadcast %cst_154 : f32 to vector<16x8xf32>
      %332 = arith.select %326, %324, %331 : vector<16x8xi1>, vector<16x8xf32>
      %cst_155 = arith.constant dense<0x7F800000> : vector<16xf32>
      %333 = vector.multi_reduction <minimumf>, %332, %cst_155 [1] : vector<16x8xf32> to vector<16xf32>
      %334 = vector.shape_cast %333 : vector<16xf32> to vector<16x1xf32>
      %c9_i32 = arith.constant 9 : i32
      %335 = vector.broadcast %c9_i32 : i32 to vector<16x1xi32>
      %336 = arith.cmpi slt, %3, %335 : vector<16x1xi32>
      %337 = arith.subf %330, %334 : vector<16x1xf32>
      %cst_156 = arith.constant 0.000000e+00 : f32
      %338 = vector.broadcast %cst_156 : f32 to vector<16x1xf32>
      %339 = arith.select %336, %337, %338 : vector<16x1xi1>, vector<16x1xf32>
      %340 = vector.shape_cast %339 : vector<16x1xf32> to vector<1x16x1xf32>
      %cst_157 = arith.constant dense<0.000000e+00> : vector<1xf32>
      %341 = vector.multi_reduction <add>, %340, %cst_157 [1, 2] : vector<1x16x1xf32> to vector<1xf32>
      %342 = vector.shape_cast %341 : vector<1xf32> to vector<1x1x1xf32>
      %343 = vector.extract %342[0, 0, 0] : f32 from vector<1x1x1xf32>
      %344 = vector.broadcast %343 : f32 to vector<1x1xf32>
      %c0_158 = arith.constant 0 : index
      %c0_159 = arith.constant 0 : index
      %345 = vector.load %arg3[%c0_158, %c0_159] : memref<1x1xf32, #tpu.memory_space<vmem>>, vector<1x1xf32>
      tpu.vector_store %arg3[%c0_158, %c0_159], %344 {strides = array<i32>} : memref<1x1xf32, #tpu.memory_space<vmem>>, vector<1x1xf32>,
    } else {
    }
    return
  }
  func.func @transform_0(%arg0: i32) -> (i32, i32) {
    %c0_i32 = arith.constant 0 : i32
    %c0_i32_0 = arith.constant 0 : i32
    return %c0_i32, %arg0 : i32, i32
  }
  func.func @transform_1(%arg0: i32) -> (i32, i32) {
    %c0_i32 = arith.constant 0 : i32
    %c0_i32_0 = arith.constant 0 : i32
    return %c0_i32, %arg0 : i32, i32
  }
  func.func @transform_2(%arg0: i32) -> (i32, i32) {
    %c0_i32 = arith.constant 0 : i32
    %c0_i32_0 = arith.constant 0 : i32
    %c0_i32_1 = arith.constant 0 : i32
    return %c0_i32, %c0_i32_0 : i32, i32
  }
}

</mosaic_0001>

<bundles_post_ra>
// kernel: tpu_custom_call.1
= control target key start
LH: loop header
LB: loop body
LE: loop exit
PB: predicated region body
PF: predicated region fallthrough
CT: control target
= control target key end

     0   :  { %7 = vsyncpa [#allocation4], 0  ;;  %s4835_s0 = inlined_call_operand.hbm [shape: f32[1,5000], index: 0, kind: input, shape index: {}]   ;;  %s4836_s1 = inlined_call_operand.hbm [shape: s32[1,5000], index: 1, kind: input, shape index: {}]   ;;  %s4837_s2 = inlined_call_operand.hbm [shape: f32[1,1], index: 2, kind: output, shape index: {}]  }
   0x1   :  { %8 = vsyncpa [#allocation7], 0 }
   0x2   :  { %9 = vsyncpa [#allocation5], 0  ;;  %s2557_s9 = smov [#allocation3]   ;;  %s2558_s11 = smov [#allocation6]  }
   0x3   :  { %s16_s10 = sshll.u32 %s2557_s9, 4  ;;  %s26_s12 = sshll.u32 %s2558_s11, 4  ;;  %s17_s10 = int_to_ptr.vmem [resolvable:$true] %s16_s10  ;;  %s27_s12 = int_to_ptr.vmem [resolvable:$true] %s26_s12 }
   0x4   :  { %s2485_s15 = scalar_lea.hbm %s4835_s0, 640 }
   0x5   :  { %p2486_p0 = scmp.ne.s32.totalorder %s4835_s0, %s2485_s15  ;;  %p2489_p1 = scmp.lt.u32.totalorder %s2485_s15, %s4835_s0 }
   0x7   :  { %p2491_p2 = pnand %p2489_p1, %p2486_p0 }
   0x9   :  { %2494 = shalt.err (!%p2491_p2)
}
   0xa   :  { %s2495_s20 = scalar_lea.vmem %s17_s10, 640  ;;  %p2500_p4 = scmp.lt.s32.totalorder %s17_s10, %s17_s10 }
   0xb   :  { %p2496_p3 = scmp.ne.s32.totalorder %s17_s10, %s2495_s20  ;;  %p2501_p5 = scmp.lt.s32.totalorder %s2495_s20, %s2495_s20 }
   0xd   :  { %p2502_p6 = por %p2501_p5, %p2500_p4 }
   0xf   :  { %p2503_p7 = pnand %p2502_p6, %p2496_p3 }
  0x11   :  { %2506 = shalt.err (!%p2503_p7)
}
  0x12   :  { %19 = dma.hbm_to_vmem [thread:$0]  %s4835_s0, 640, %s17_s10, [#allocation4]  }
  0x13   :  { %s2507_s25 = scalar_lea.hbm %s4836_s1, 640 }
  0x14   :  { %p2508_p8 = scmp.ne.s32.totalorder %s4836_s1, %s2507_s25  ;;  %p2511_p9 = scmp.lt.u32.totalorder %s2507_s25, %s4836_s1 }
  0x16   :  { %p2513_p10 = pnand %p2511_p9, %p2508_p8 }
  0x18   :  { %2516 = shalt.err (!%p2513_p10)
}
  0x19   :  { %s2517_s30 = scalar_lea.vmem %s27_s12, 640  ;;  %p2522_p12 = scmp.lt.s32.totalorder %s27_s12, %s27_s12 }
  0x1a   :  { %p2518_p11 = scmp.ne.s32.totalorder %s27_s12, %s2517_s30  ;;  %p2523_p13 = scmp.lt.s32.totalorder %s2517_s30, %s2517_s30 }
  0x1c   :  { %p2524_p0 = por %p2523_p13, %p2522_p12 }
  0x1e   :  { %p2525_p1 = pnand %p2524_p0, %p2518_p11 }
  0x20   :  { %2528 = shalt.err (!%p2525_p1)
}
  0x21   :  { %29 = dma.hbm_to_vmem [thread:$0]  %s4836_s1, 640, %s27_s12, [#allocation7]  }
  0x22   :  { %2551 = dma.done.wait [#allocation4], 640  }
  0x23   :  { %2552 = vsyncadd [#allocation4], 4294966656 }
  0x24   :  { %2553 = dma.done.wait [#allocation7], 640  }
  0x25   :  { %2554 = vsyncadd [#allocation7], 4294966656  ;;  %v4839_v0 = vlaneseq  ;;  %v2559_v1 = vmov 1966171168   ;;  %v4838_v5 = vmov 1   ;;  %v64_v7 = vld [vmem:[#allocation3] sm:$0xff] }
  0x26   :  { %v209_v2 = vunpack.c.l.s4 %v2559_v1  ;;  %v204_v6 = vcombine.low %v4838_v5, %v4838_v5  ;;  %v2425_v9 = vmul.f32 -1.442695, %v64_v7  ;;  %v505_v14 = vld [vmem:[#allocation3 + $0x8] sm:$0xff]  ;;  %v4869_v18 = vmov 0  ;;  %v2634_v24 = vld [vmem:[#allocation6 + $0x8] sm:$0xff]  ;;  %s2563_s1 = smov [#allocation8]  }
  0x27   :  { %v2604_v3 = vshrl.u32 %v4839_v0, 7  ;;  %v65_v16 = vld [vmem:[#allocation6] sm:$0xff]  ;;  %v2427_v17 = vmul.f32 -1.442695, %v505_v14  ;;  %v4840_v27 = vmov 0   ;;  %vm637_vm8 = vcmp.eq.s32.totalorder %v2634_v24, 0 }
  0x28   :  { %v210_v4 = vunpack.c.0.s8 %v209_v2  ;;  %2463 = vpow2.f32 %v2425_v9  ;;  %vm195_vm0 = vcmp.eq.s32.totalorder %v65_v16, 0  ;;  %vm337_vm2 = vcmp.eq.s32.totalorder %v65_v16, 1  ;;  %s2415_s4 = sshll.u32 %s2563_s1, 4  ;;  %s2416_s4 = int_to_ptr.vmem [resolvable:$true] %s2415_s4 }
  0x29   :  { %4864 = vst [vmem:[#allocation12_spill] sm:$0xff] %v2604_v3  ;;  %v2622_v15 = vadd.s32 8, %v2604_v3  ;;  %2465 = vpow2.f32 %v2427_v17  ;;  %v48_v22 = vcvt.s32.f32 %v2604_v3  ;;  %vm421_vm4 = vcmp.eq.s32.totalorder %v65_v16, 2  ;;  %s2529_s6 = scalar_lea.vmem %s2416_s4, 16  ;;  %s2533_s7 = scalar_lea.vmem %s2416_s4, 32 }
  0x2a   :  { %v2609_v8 = vsub.s32 %v210_v4, %v2604_v3  ;;  %v2638_v25 = vsub.s32 0, %v2604_v3  ;;  %v2641_v26 = vsub.s32 1, %v2604_v3  ;;  %v2647_v29 = vsub.s32 2, %v2604_v3  ;;  %p2530_p2 = scmp.ne.s32.totalorder %s2416_s4, %s2529_s6  ;;  %p2534_p3 = scmp.lt.s32.totalorder %s2416_s4, %s2416_s4 }
  0x2b   :  { %4868 = vst [vmem:[#allocation16_spill] sm:$0xff] %v2622_v15  ;;  %v49_v20 = vcvt.s32.f32 %v2622_v15  ;;  %vm4844_vm6 = vcmp.lt.s32.totalorder %v2622_v15, 10  ;;  %v2650_v30 = vsub.s32 3, %v2604_v3  ;;  %v2653_v31 = vsub.s32 4, %v2604_v3  ;;  %p2535_p4 = scmp.lt.s32.totalorder %s2533_s7, %s2529_s6 }
  0x2c   :  { %4865 = vst [vmem:[#allocation13_spill] sm:$0xff] %v2609_v8  ;;  %v2612_v10 = vrot.slane %v204_v6, %v2609_v8  ;;  %v2656_v32 = vsub.s32 5, %v2604_v3  ;;  %v2660_v33 = vmul.f32 0.1, %v48_v22  ;;  %v2663_v34 = vsub.s32 6, %v2604_v3 }
  0x2d   :  { %v51_v23 = vmul.f32 0.1, %v49_v20  ;;  %v2674_v37 = vsub.s32 7, %v2604_v3  ;;  %p2536_p5 = por %p2535_p4, %p2534_p3 }
  0x2e   :  { %4866 = vst [vmem:[#allocation14_spill] sm:$0xff] %v2612_v10  ;;  %v236_v11 = vcombine.low %v2612_v10, %v2612_v10 }
  0x2f   :  { %v2671_v36 = vsel %vm4844_vm6, %v51_v23, 1e+09  ;;  %p2537_p6 = pnand %p2536_p5, %p2530_p2 }
  0x30   :  { %v2617_v12 = vrot.slane %v236_v11, %v2609_v8  ;;  %4872 = vst [vmem:[#allocation18_spill] sm:$0xff] %v2671_v36 }
  0x32   :  { %4867 = vst [vmem:[#allocation15_spill] sm:$0xff] %v2617_v12  ;;  %v252_v13 = vcombine.low %v2617_v12, %v2617_v12  ;;  %v2464_v19 = vpop.eup %2463 }
  0x33   :  { %v86_v21 = vadd.f32 1.0, %v2464_v19  ;;  %v2466_v52 = vpop.eup %2465 }
  0x34   :  { %vm2624_vm1 = vcmp.ne.s32.totalorder %v252_v13, 0  ;;  %v2732_v6 = vadd.f32 1.0, %v2466_v52 }
  0x35   :  { %v4870_v18 = vsel %vm2624_vm1, 4294967295, %v4869_v18  ;;  %vm254_vm3 = vmand %vm195_vm0, %vm2624_vm1  ;;  %2467 = vrcp.f32 %v86_v21 }
  0x36   :  { %4871 = vst [vmem:[#allocation17_spill] sm:$0xff] %v4870_v18  ;;  %vm338_vm5 = vmand %vm337_vm2, %vm2624_vm1  ;;  %v2644_v28 = vsel %vm254_vm3, 1, %v4840_v27  ;;  %2469 = vrcp.f32 %v2732_v6 }
  0x37   :  { %vm422_vm7 = vmand %vm421_vm4, %vm2624_vm1  ;;  %v2666_v35 = vsel %vm338_vm5, 1, %v4840_v27  ;;  %v259_v38 = vrot.slane %v2644_v28, %v2638_v25  ;;  %v263_v39 = vrot.slane %v2644_v28, %v2641_v26  ;;  %v267_v40 = vrot.slane %v2644_v28, %v2647_v29 }
  0x38   :  { %v271_v41 = vrot.slane %v2644_v28, %v2650_v30  ;;  %v275_v42 = vrot.slane %v2644_v28, %v2653_v31  ;;  %v2687_v43 = vsel %vm422_vm7, 1, %v4840_v27  ;;  %v279_v44 = vrot.slane %v2644_v28, %v2656_v32  ;;  %vm696_vm9 = vmand %vm637_vm8, %vm2624_vm1 }
  0x39   :  { %v283_v45 = vrot.slane %v2644_v28, %v2663_v34  ;;  %v287_v46 = vrot.slane %v2644_v28, %v2674_v37  ;;  %v343_v47 = vrot.slane %v2666_v35, %v2638_v25  ;;  %v347_v48 = vrot.slane %v2666_v35, %v2641_v26 }
  0x3a   :  { %v351_v49 = vrot.slane %v2666_v35, %v2647_v29  ;;  %v355_v50 = vrot.slane %v2666_v35, %v2650_v30  ;;  %v2722_v61 = vsel %vm696_vm9, 1, %v4840_v27  ;;  %vm2750_vm10 = vcmp.eq.s32.totalorder %v259_v38, 1 }
  0x3b   :  { %vm2754_vm11 = vcmp.eq.s32.totalorder %v263_v39, 1  ;;  %vm2770_vm12 = vcmp.eq.s32.totalorder %v267_v40, 1  ;;  %vm2774_vm13 = vcmp.eq.s32.totalorder %v271_v41, 1  ;;  %vm2778_vm14 = vcmp.eq.s32.totalorder %v275_v42, 1 }
  0x3c   :  { %vm2782_vm15 = vcmp.eq.s32.totalorder %v279_v44, 1  ;;  %vm2794_vm0 = vcmp.eq.s32.totalorder %v283_v45, 1  ;;  %vm2835_vm2 = vcmp.eq.s32.totalorder %v287_v46, 1  ;;  %vm2869_vm3 = vcmp.eq.s32.totalorder %v343_v47, 1 }
  0x3d   :  { %vm2876_vm4 = vcmp.eq.s32.totalorder %v347_v48, 1  ;;  %vm2885_vm5 = vcmp.eq.s32.totalorder %v351_v49, 1  ;;  %vm2892_vm7 = vcmp.eq.s32.totalorder %v355_v50, 1  ;;  %v4903_v50 = vrot.slane %v2666_v35, %v2663_v34 }
  0x3e   :  { %v4924_v17 = vrot.slane %v2687_v43, %v2656_v32  ;;  %v4930_v39 = vrot.slane %v2687_v43, %v2674_v37 }
  0x3f   :  { %v2468_v57 = vpop.eup %2467  ;;  %vm2913_vm6 = vcmp.eq.s32.totalorder %v4903_v50, 1 }
  0x40   :  { %v2426_v62 = vadd.f32 -0.0001, %v2468_v57  ;;  %v2470_v19 = vpop.eup %2469 }
  0x42   :  { %v2739_v11 = vrot.slane %v2426_v62, %v2638_v25  ;;  %v2742_v13 = vrot.slane %v2426_v62, %v2641_v26  ;;  %v2745_v14 = vrot.slane %v2426_v62, %v2647_v29  ;;  %v2748_v16 = vrot.slane %v2426_v62, %v2650_v30 }
  0x43   :  { %v2759_v20 = vrot.slane %v2426_v62, %v2653_v31  ;;  %v2762_v21 = vrot.slane %v2426_v62, %v2656_v32  ;;  %v2765_v22 = vrot.slane %v2426_v62, %v2663_v34  ;;  %v2768_v23 = vrot.slane %v2426_v62, %v2674_v37 }
  0x44   :  { %v131_v62 = vsub.f32 %v2739_v11, %v2660_v33  ;;  %v132_v40 = vsub.f32 %v2742_v13, %v2660_v33  ;;  %v133_v41 = vsub.f32 %v2745_v14, %v2660_v33  ;;  %v134_v5 = vsub.f32 %v2748_v16, %v2660_v33 }
  0x45   :  { %v135_v44 = vsub.f32 %v2759_v20, %v2660_v33  ;;  %v136_v0 = vsub.f32 %v2762_v21, %v2660_v33  ;;  %v137_v27 = vsub.f32 %v2765_v22, %v2660_v33  ;;  %v138_v9 = vsub.f32 %v2768_v23, %v2660_v33 }
  0x46   :  { %v147_v7 = vand.u32 2147483647, %v131_v62  ;;  %v148_v4 = vand.u32 2147483647, %v132_v40  ;;  %v149_v2 = vand.u32 2147483647, %v133_v41  ;;  %v139_v59 = vsub.f32 %v2739_v11, %v2671_v36 }
  0x47   :  { %v150_v1 = vand.u32 2147483647, %v134_v5  ;;  %v151_v63 = vand.u32 2147483647, %v135_v44  ;;  %v152_v60 = vand.u32 2147483647, %v136_v0  ;;  %v140_v54 = vsub.f32 %v2742_v13, %v2671_v36 }
  0x48   :  { %v153_v58 = vand.u32 2147483647, %v137_v27  ;;  %v154_v56 = vand.u32 2147483647, %v138_v9  ;;  %v163_v55 = vsub.f32 0.1, %v147_v7  ;;  %v141_v40 = vsub.f32 %v2745_v14, %v2671_v36 }
  0x49   :  { %v164_v53 = vsub.f32 0.1, %v148_v4  ;;  %v165_v51 = vsub.f32 0.1, %v149_v2  ;;  %v166_v62 = vsub.f32 0.1, %v150_v1  ;;  %v142_v0 = vsub.f32 %v2748_v16, %v2671_v36 }
  0x4a   :  { %v167_v41 = vsub.f32 0.1, %v151_v63  ;;  %v168_v45 = vsub.f32 0.1, %v152_v60  ;;  %v169_v5 = vsub.f32 0.1, %v153_v58  ;;  %v144_v16 = vsub.f32 %v2762_v21, %v2671_v36 }
  0x4b   :  { %v170_v44 = vsub.f32 0.1, %v154_v56  ;;  %v2816_v11 = vmax.f32 %v163_v55, 0.0  ;;  %v2818_v27 = vmax.f32 %v164_v53, 0.0  ;;  %v2820_v7 = vmax.f32 %v165_v51, 0.0 }
  0x4c   :  { %v2822_v9 = vmax.f32 %v166_v62, 0.0  ;;  %v2824_v2 = vmax.f32 %v167_v41, 0.0  ;;  %v2826_v1 = vmax.f32 %v168_v45, 0.0  ;;  %v2828_v4 = vmax.f32 %v169_v5, 0.0 }
  0x4d   :  { %v2830_v60 = vmax.f32 %v170_v44, 0.0  ;;  %v296_v51 = vsel %vm2750_vm10, %v2816_v11, 0.0  ;;  %v297_v53 = vsel %vm2754_vm11, %v2818_v27, 0.0  ;;  %v143_v56 = vsub.f32 %v2759_v20, %v2671_v36 }
  0x4e   :  { %v298_v58 = vsel %vm2770_vm12, %v2820_v7, 0.0  ;;  %v299_v28 = vsel %vm2774_vm13, %v2822_v9, 0.0  ;;  %v300_v46 = vsel %vm2778_vm14, %v2824_v2, 0.0  ;;  %v301_v63 = vsel %vm2782_vm15, %v2826_v1, 0.0 }
  0x4f   :  { %v302_v13 = vsel %vm2794_vm0, %v2828_v4, 0.0  ;;  %v312_v14 = vadd.f32 %v297_v53, %v296_v51  ;;  %v145_v20 = vsub.f32 %v2765_v22, %v2671_v36  ;;  %v146_v21 = vsub.f32 %v2768_v23, %v2671_v36 }
  0x50   :  { %v155_v41 = vand.u32 2147483647, %v139_v59  ;;  %v156_v5 = vand.u32 2147483647, %v140_v54  ;;  %v157_v22 = vand.u32 2147483647, %v141_v40  ;;  %v4897_v54 = vrot.slane %v2666_v35, %v2653_v31 }
  0x51   :  { %v313_v44 = vadd.f32 %v312_v14, %v298_v58  ;;  %v158_v51 = vand.u32 2147483647, %v142_v0  ;;  %v159_v53 = vand.u32 2147483647, %v143_v56  ;;  %v160_v48 = vand.u32 2147483647, %v144_v16 }
  0x52   :  { %vm2899_vm8 = vcmp.eq.s32.totalorder %v4897_v54, 1  ;;  %v161_v49 = vand.u32 2147483647, %v145_v20  ;;  %v162_v23 = vand.u32 2147483647, %v146_v21  ;;  %v4900_v0 = vrot.slane %v2666_v35, %v2656_v32 }
  0x53   :  { %v171_v40 = vsub.f32 0.1, %v155_v41  ;;  %v4901_v56 = vmov 0  ;;  %v4904_v58 = vmov 0  ;;  %v314_v14 = vadd.f32 %v313_v44, %v299_v28 }
  0x54   :  { %vm2906_vm9 = vcmp.eq.s32.totalorder %v4900_v0, 1  ;;  %v4905_v58 = vsel %vm2913_vm6, 4294967295, %v4904_v58  ;;  %v172_v16 = vsub.f32 0.1, %v156_v5  ;;  %v173_v20 = vsub.f32 0.1, %v157_v22 }
  0x55   :  { %v4902_v56 = vsel %vm2906_vm9, 4294967295, %v4901_v56  ;;  %v174_v21 = vsub.f32 0.1, %v158_v51  ;;  %v4906_v41 = vrot.slane %v2666_v35, %v2674_v37  ;;  %v4907_v54 = vmov 0 }
  0x56   :  { %v175_v0 = vsub.f32 0.1, %v159_v53  ;;  %v176_v3 = vsub.f32 0.1, %v160_v48  ;;  %v177_v12 = vsub.f32 0.1, %v161_v49  ;;  %v315_v10 = vadd.f32 %v314_v14, %v300_v46 }
  0x57   :  { %vm2921_vm1 = vcmp.eq.s32.totalorder %v4906_v41, 1  ;;  %v178_v8 = vsub.f32 0.1, %v162_v23  ;;  %v2927_v6 = vmax.f32 %v171_v40, 0.0  ;;  %v2929_v28 = vmax.f32 %v172_v16, 0.0 }
  0x58   :  { %v4908_v54 = vsel %vm2921_vm1, 4294967295, %v4907_v54  ;;  %v4909_v5 = vrot.slane %v2687_v43, %v2638_v25  ;;  %v4912_v22 = vrot.slane %v2687_v43, %v2641_v26  ;;  %v4913_v44 = vmov 0 }
  0x59   :  { %v2945_v46 = vmax.f32 %v173_v20, 0.0  ;;  %v2947_v51 = vmax.f32 %v174_v21, 0.0  ;;  %v2949_v53 = vmax.f32 %v175_v0, 0.0  ;;  %v2951_v48 = vmax.f32 %v176_v3, 0.0 }
  0x5a   :  { %vm2934_vm6 = vcmp.eq.s32.totalorder %v4909_v5, 1  ;;  %vm2941_vm1 = vcmp.eq.s32.totalorder %v4912_v22, 1  ;;  %v4915_v49 = vrot.slane %v2687_v43, %v2647_v29  ;;  %v4916_v23 = vmov 0 }
  0x5b   :  { %v4914_v44 = vsel %vm2941_vm1, 4294967295, %v4913_v44  ;;  %v316_v40 = vadd.f32 %v315_v10, %v301_v63  ;;  %v2960_v14 = vmax.f32 %v177_v12, 0.0  ;;  %v2962_v16 = vmax.f32 %v178_v8, 0.0 }
  0x5c   :  { %vm2956_vm9 = vcmp.eq.s32.totalorder %v4915_v49, 1  ;;  %v304_v20 = vsel %vm2750_vm10, %v2927_v6, 0.0  ;;  %v4918_v3 = vrot.slane %v2687_v43, %v2650_v30  ;;  %v4919_v21 = vmov 0 }
  0x5d   :  { %v4917_v23 = vsel %vm2956_vm9, 4294967295, %v4916_v23  ;;  %v4921_v41 = vrot.slane %v2687_v43, %v2653_v31  ;;  %v303_v8 = vsel %vm2835_vm2, %v2830_v60, 0.0  ;;  %v305_v12 = vsel %vm2754_vm11, %v2929_v28, 0.0 }
  0x5e   :  { %vm2970_vm1 = vcmp.eq.s32.totalorder %v4918_v3, 1  ;;  %vm2990_vm10 = vcmp.eq.s32.totalorder %v4924_v17, 1  ;;  %v4927_v0 = vrot.slane %v2687_v43, %v2663_v34  ;;  %v317_v49 = vadd.f32 %v316_v40, %v302_v13 }
  0x5f   :  { %v4920_v21 = vsel %vm2970_vm1, 4294967295, %v4919_v21  ;;  %vm2977_vm9 = vcmp.eq.s32.totalorder %v4921_v41, 1  ;;  %v306_v3 = vsel %vm2770_vm12, %v2945_v46, 0.0  ;;  %v307_v41 = vsel %vm2774_vm13, %v2947_v51, 0.0 }
  0x60   :  { %vm2997_vm1 = vcmp.eq.s32.totalorder %v4927_v0, 1  ;;  %v308_v17 = vsel %vm2778_vm14, %v2949_v53, 0.0  ;;  %v309_v0 = vsel %vm2782_vm15, %v2951_v48, 0.0  ;;  %v321_v22 = vadd.f32 %v305_v12, %v304_v20 }
  0x61   :  { %v380_v13 = vsel %vm2869_vm3, %v2816_v11, 0.0  ;;  %v381_v38 = vsel %vm2876_vm4, %v2818_v27, 0.0  ;;  %vm3026_vm11 = vcmp.eq.s32.totalorder %v4930_v39, 1  ;;  %v318_v52 = vadd.f32 %v317_v49, %v303_v8 }
  0x62   :  { %v310_v57 = vsel %vm2794_vm0, %v2960_v14, 0.0  ;;  %v311_v20 = vsel %vm2835_vm2, %v2962_v16, 0.0  ;;  %v382_v12 = vsel %vm2885_vm5, %v2820_v7, 0.0  ;;  %v322_v50 = vadd.f32 %v321_v22, %v306_v3 }
  0x63   :  { %v383_v43 = vsel %vm2892_vm7, %v2822_v9, 0.0  ;;  %v384_v8 = vsel %vm2899_vm8, %v2824_v2, 0.0  ;;  %v396_v42 = vadd.f32 %v381_v38, %v380_v13  ;;  %319 = vadd.xlane.f32.xlu0 %v318_v52  ;;  %vm4933_vm12 = vnez %v4902_v56 }
  0x64   :  { %v385_v55 = vsel %vm4933_vm12, %v2826_v1, 0.0  ;;  %vm4934_vm13 = vnez %v4905_v58  ;;  %v388_v22 = vsel %vm2869_vm3, %v2927_v6, 0.0  ;;  %v389_v3 = vsel %vm2876_vm4, %v2929_v28, 0.0 }
  0x65   :  { %v386_v49 = vsel %vm4934_vm13, %v2828_v4, 0.0  ;;  %v323_v39 = vadd.f32 %v322_v50, %v307_v41  ;;  %vm4935_vm14 = vnez %v4908_v54  ;;  %v397_v38 = vadd.f32 %v396_v42, %v382_v12 }
  0x66   :  { %v387_v13 = vsel %vm4935_vm14, %v2830_v60, 0.0  ;;  %v390_v52 = vsel %vm2885_vm5, %v2945_v46, 0.0  ;;  %v391_v18 = vsel %vm2892_vm7, %v2947_v51, 0.0  ;;  %v392_v45 = vsel %vm2899_vm8, %v2949_v53, 0.0 }
  0x67   :  { %v393_v62 = vsel %vm4933_vm12, %v2951_v48, 0.0  ;;  %v405_v50 = vadd.f32 %v389_v3, %v388_v22  ;;  %v324_v41 = vadd.f32 %v323_v39, %v308_v17  ;;  %v398_v36 = vadd.f32 %v397_v38, %v383_v43 }
  0x68   :  { %v464_v47 = vsel %vm2934_vm6, %v2816_v11, 0.0  ;;  %vm4936_vm15 = vnez %v4914_v44  ;;  %v394_v59 = vsel %vm4934_vm13, %v2960_v14, 0.0  ;;  %v395_v56 = vsel %vm4935_vm14, %v2962_v16, 0.0 }
  0x69   :  { %v465_v15 = vsel %vm4936_vm15, %v2818_v27, 0.0  ;;  %v406_v12 = vadd.f32 %v405_v50, %v390_v52  ;;  %vm4937_vm0 = vnez %v4917_v23  ;;  %v325_v43 = vadd.f32 %v324_v41, %v309_v0 }
  0x6a   :  { %v466_v17 = vsel %vm4937_vm0, %v2820_v7, 0.0  ;;  %v399_v42 = vadd.f32 %v398_v36, %v384_v8  ;;  %vm4938_vm2 = vnez %v4920_v21  ;;  %v468_v27 = vsel %vm2977_vm9, %v2824_v2, 0.0 }
  0x6b   :  { %v467_v11 = vsel %vm4938_vm2, %v2822_v9, 0.0  ;;  %v407_v58 = vadd.f32 %v406_v12, %v391_v18  ;;  %v469_v54 = vsel %vm2990_vm10, %v2826_v1, 0.0  ;;  %v470_v22 = vsel %vm2997_vm1, %v2828_v4, 0.0 }
  0x6c   :  { %v480_v7 = vadd.f32 %v465_v15, %v464_v47  ;;  %v326_v0 = vadd.f32 %v325_v43, %v310_v57  ;;  %v400_v36 = vadd.f32 %v399_v42, %v385_v55  ;;  %v472_v9 = vsel %vm2934_vm6, %v2927_v6, 0.0 }
  0x6d   :  { %v473_v2 = vsel %vm4936_vm15, %v2929_v28, 0.0  ;;  %v408_v18 = vadd.f32 %v407_v58, %v392_v45  ;;  %v471_v1 = vsel %vm3026_vm11, %v2830_v60, 0.0  ;;  %v474_v4 = vsel %vm4937_vm0, %v2945_v46, 0.0 }
  0x6e   :  { %v481_v8 = vadd.f32 %v480_v7, %v466_v17  ;;  %v327_v57 = vadd.f32 %v326_v0, %v311_v20  ;;  %v401_v55 = vadd.f32 %v400_v36, %v386_v49  ;;  %v475_v6 = vsel %vm4938_vm2, %v2947_v51, 0.0 }
  0x6f   :  { %v476_v28 = vsel %vm2977_vm9, %v2949_v53, 0.0  ;;  %v409_v35 = vadd.f32 %v408_v18, %v393_v62  ;;  %v489_v3 = vadd.f32 %v473_v2, %v472_v9  ;;  %v2428_v39 = vadd.f32 -0.0001, %v2470_v19 }
  0x70   :  { %v482_v44 = vadd.f32 %v481_v8, %v467_v11  ;;  %328 = vadd.xlane.f32.xlu0 %v327_v57  ;;  %v402_v60 = vadd.f32 %v401_v55, %v387_v13  ;;  %v477_v46 = vsel %vm2990_vm10, %v2951_v48, 0.0  ;;  %v478_v23 = vsel %vm2997_vm1, %v2960_v14, 0.0 }
  0x71   :  { %v479_v51 = vsel %vm3026_vm11, %v2962_v16, 0.0  ;;  %v410_v21 = vadd.f32 %v409_v35, %v394_v59  ;;  %v490_v10 = vadd.f32 %v489_v3, %v474_v4  ;;  %v3127_v20 = vrot.slane %v2428_v39, %v2638_v25 }
  0x72   :  { %v483_v53 = vadd.f32 %v482_v44, %v468_v27  ;;  %403 = vadd.xlane.f32.xlu1 %v402_v60  ;;  %v3130_v19 = vrot.slane %v2428_v39, %v2641_v26  ;;  %v3133_v48 = vrot.slane %v2428_v39, %v2647_v29  ;;  %v3136_v63 = vrot.slane %v2428_v39, %v2650_v30 }
  0x73   :  { %v3139_v14 = vrot.slane %v2428_v39, %v2653_v31  ;;  %v411_v16 = vadd.f32 %v410_v21, %v395_v56  ;;  %v491_v40 = vadd.f32 %v490_v10, %v475_v6  ;;  %v3142_v49 = vrot.slane %v2428_v39, %v2656_v32 }
  0x74   :  { %v484_v5 = vadd.f32 %v483_v53, %v469_v54  ;;  %v3145_v13 = vrot.slane %v2428_v39, %v2663_v34  ;;  %v3148_v38 = vrot.slane %v2428_v39, %v2674_v37  ;;  %v573_v52 = vsub.f32 %v3127_v20, %v2660_v33 }
  0x75   :  { %v574_v45 = vsub.f32 %v3130_v19, %v2660_v33  ;;  %v4939_v62 = vrot.slane %v2722_v61, %v2638_v25  ;;  %v492_v47 = vadd.f32 %v491_v40, %v476_v28  ;;  %v575_v15 = vsub.f32 %v3133_v48, %v2660_v33 }
  0x76   :  { %v485_v41 = vadd.f32 %v484_v5, %v470_v22  ;;  %v576_v59 = vsub.f32 %v3136_v63, %v2660_v33  ;;  %v4942_v56 = vrot.slane %v2722_v61, %v2641_v26  ;;  %v4945_v17 = vrot.slane %v2722_v61, %v2647_v29  ;;  %412 = vadd.xlane.f32.xlu1 %v411_v16 }
  0x77   :  { %vm3157_vm1 = vcmp.eq.s32.totalorder %v4939_v62, 1  ;;  %v577_v42 = vsub.f32 %v3139_v14, %v2660_v33  ;;  %v578_v11 = vsub.f32 %v3142_v49, %v2660_v33  ;;  %v579_v27 = vsub.f32 %v3145_v13, %v2660_v33 }
  0x78   :  { %vm3168_vm6 = vcmp.eq.s32.totalorder %v4942_v56, 1  ;;  %vm3175_vm3 = vcmp.eq.s32.totalorder %v4945_v17, 1  ;;  %v580_v58 = vsub.f32 %v3148_v38, %v2660_v33  ;;  %v486_v54 = vadd.f32 %v485_v41, %v471_v1  ;;  %v4954_v41 = vld [vmem:[#allocation18_spill] sm:$0xff] }
  0x79   :  { %v493_v22 = vadd.f32 %v492_v47, %v477_v46  ;;  %v589_v7 = vand.u32 2147483647, %v573_v52  ;;  %v590_v0 = vand.u32 2147483647, %v574_v45  ;;  %v591_v36 = vand.u32 2147483647, %v575_v15 }
  0x7a   :  { %v592_v9 = vand.u32 2147483647, %v576_v59  ;;  %v593_v2 = vand.u32 2147483647, %v577_v42  ;;  %v725_v18 = vrot.slane %v2722_v61, %v2663_v34  ;;  %487 = vadd.xlane.f32.xlu0 %v486_v54  ;;  %v594_v4 = vand.u32 2147483647, %v578_v11 }
  0x7b   :  { %v494_v8 = vadd.f32 %v493_v22, %v478_v23  ;;  %v595_v57 = vand.u32 2147483647, %v579_v27  ;;  %v596_v55 = vand.u32 2147483647, %v580_v58  ;;  %vm778_vm4 = vcmp.eq.s32.totalorder %v2634_v24, 1 }
  0x7c   :  { %v605_v6 = vsub.f32 0.1, %v589_v7  ;;  %v606_v28 = vsub.f32 0.1, %v590_v0  ;;  %v607_v35 = vsub.f32 0.1, %v591_v36  ;;  %v729_v1 = vrot.slane %v2722_v61, %v2674_v37 }
  0x7d   :  { %v495_v44 = vadd.f32 %v494_v8, %v479_v51  ;;  %v608_v3 = vsub.f32 0.1, %v592_v9  ;;  %v609_v39 = vsub.f32 0.1, %v593_v2  ;;  %v610_v60 = vsub.f32 0.1, %v594_v4 }
  0x7e   :  { %v611_v46 = vsub.f32 0.1, %v595_v57  ;;  %v612_v21 = vsub.f32 0.1, %v596_v55  ;;  %v3192_v53 = vmax.f32 %v605_v6, 0.0  ;;  %v3194_v23 = vmax.f32 %v606_v28, 0.0 }
  0x7f   :  { %496 = vadd.xlane.f32.xlu1 %v495_v44  ;;  %v3196_v10 = vmax.f32 %v607_v35, 0.0  ;;  %v3198_v16 = vmax.f32 %v608_v3, 0.0  ;;  %v3200_v5 = vmax.f32 %v609_v39, 0.0  ;;  %v3202_v40 = vmax.f32 %v610_v60, 0.0 }
  0x80   :  { %v4948_v51 = vrot.slane %v2722_v61, %v2650_v30  ;;  %v4951_v45 = vrot.slane %v2722_v61, %v2653_v31  ;;  %v581_v47 = vsub.f32 %v3127_v20, %v4954_v41  ;;  %v582_v15 = vsub.f32 %v3130_v19, %v4954_v41 }
  0x81   :  { %v3222_v59 = vmax.f32 %v611_v46, 0.0  ;;  %v3224_v56 = vmax.f32 %v612_v21, 0.0  ;;  %v4955_v17 = vrot.slane %v2722_v61, %v2656_v32  ;;  %v738_v11 = vsel %vm3157_vm1, %v3192_v53, 0.0 }
  0x82   :  { %vm3207_vm5 = vcmp.eq.s32.totalorder %v4948_v51, 1  ;;  %vm3214_vm7 = vcmp.eq.s32.totalorder %v4951_v45, 1  ;;  %vm3236_vm9 = vcmp.eq.s32.totalorder %v725_v18, 1  ;;  %vm3240_vm10 = vcmp.eq.s32.totalorder %v729_v1, 1 }
  0x83   :  { %vm3229_vm8 = vcmp.eq.s32.totalorder %v4955_v17, 1  ;;  %v739_v61 = vsel %vm3168_vm6, %v3194_v23, 0.0  ;;  %v740_v27 = vsel %vm3175_vm3, %v3196_v10, 0.0  ;;  %v741_v58 = vsel %vm3207_vm5, %v3198_v16, 0.0 }
  0x84   :  { %v742_v54 = vsel %vm3214_vm7, %v3200_v5, 0.0  ;;  %v743_v22 = vsel %vm3229_vm8, %v3202_v40, 0.0  ;;  %v754_v7 = vadd.f32 %v739_v61, %v738_v11  ;;  %v583_v0 = vsub.f32 %v3133_v48, %v4954_v41 }
  0x85   :  { %v584_v36 = vsub.f32 %v3136_v63, %v4954_v41  ;;  %v585_v9 = vsub.f32 %v3139_v14, %v4954_v41  ;;  %v586_v2 = vsub.f32 %v3142_v49, %v4954_v41  ;;  %vm861_vm11 = vcmp.eq.s32.totalorder %v2634_v24, 2  ;;  %v4962_v63 = vld [vmem:[#allocation17_spill] sm:$0xff] }
  0x86   :  { %v755_v18 = vadd.f32 %v754_v7, %v740_v27  ;;  %v587_v8 = vsub.f32 %v3145_v13, %v4954_v41  ;;  %v588_v4 = vsub.f32 %v3148_v38, %v4954_v41  ;;  %v597_v57 = vand.u32 2147483647, %v581_v47  ;;  %v944_v27 = vld [vmem:[#allocation3 + $0x10] sm:$0xff] }
  0x87   :  { %v598_v48 = vand.u32 2147483647, %v582_v15  ;;  %v599_v55 = vand.u32 2147483647, %v583_v0  ;;  %v600_v6 = vand.u32 2147483647, %v584_v36  ;;  %vm4963_vm12 = vnez %v4962_v63 }
  0x88   :  { %vm779_vm13 = vmand %vm778_vm4, %vm4963_vm12  ;;  %v756_v14 = vadd.f32 %v755_v18, %v741_v58  ;;  %v601_v49 = vand.u32 2147483647, %v585_v9  ;;  %v602_v28 = vand.u32 2147483647, %v586_v2  ;;  %v603_v35 = vand.u32 2147483647, %v587_v8 }
  0x89   :  { %v604_v1 = vand.u32 2147483647, %v588_v4  ;;  %v613_v44 = vsub.f32 0.1, %v597_v57  ;;  %v614_v3 = vsub.f32 0.1, %v598_v48  ;;  %vm862_vm14 = vmand %vm861_vm11, %vm4963_vm12 }
  0x8a   :  { %v757_v13 = vadd.f32 %v756_v14, %v742_v54  ;;  %v615_v39 = vsub.f32 0.1, %v599_v55  ;;  %v616_v60 = vsub.f32 0.1, %v600_v6  ;;  %v4964_v38 = vmov 0  }
  0x8b   :  { %v3277_v46 = vsel %vm779_vm13, 1, %v4964_v38  ;;  %v744_v21 = vsel %vm3236_vm9, %v3222_v59, 0.0  ;;  %v745_v51 = vsel %vm3240_vm10, %v3224_v56, 0.0  ;;  %v617_v45 = vsub.f32 0.1, %v601_v49 }
  0x8c   :  { %v618_v47 = vsub.f32 0.1, %v602_v28  ;;  %v758_v15 = vadd.f32 %v757_v13, %v743_v22  ;;  %v3285_v17 = vmax.f32 %v613_v44, 0.0  ;;  %v3287_v11 = vmax.f32 %v614_v3, 0.0 }
  0x8d   :  { %v3289_v61 = vmax.f32 %v615_v39, 0.0  ;;  %v619_v58 = vsub.f32 0.1, %v603_v35  ;;  %v620_v54 = vsub.f32 0.1, %v604_v1  ;;  %v3291_v7 = vmax.f32 %v616_v60, 0.0 }
  0x8e   :  { %v784_v0 = vrot.slane %v3277_v46, %v2638_v25  ;;  %v759_v36 = vadd.f32 %v758_v15, %v744_v21  ;;  %v746_v9 = vsel %vm3157_vm1, %v3285_v17, 0.0  ;;  %v747_v22 = vsel %vm3168_vm6, %v3287_v11, 0.0 }
  0x8f   :  { %v788_v2 = vrot.slane %v3277_v46, %v2641_v26  ;;  %v3303_v18 = vmax.f32 %v617_v45, 0.0  ;;  %v748_v8 = vsel %vm3175_vm3, %v3289_v61, 0.0  ;;  %v792_v4 = vrot.slane %v3277_v46, %v2647_v29 }
  0x90   :  { %v2429_v57 = vmul.f32 -1.442695, %v944_v27  ;;  %v760_v48 = vadd.f32 %v759_v36, %v745_v51  ;;  %v3310_v50 = vmax.f32 %v618_v47, 0.0  ;;  %v763_v55 = vadd.f32 %v747_v22, %v746_v9 }
  0x91   :  { %v3316_v12 = vmax.f32 %v619_v58, 0.0  ;;  %v3318_v6 = vmax.f32 %v620_v54, 0.0  ;;  %v749_v43 = vsel %vm3207_vm5, %v3291_v7, 0.0  ;;  %v796_v14 = vrot.slane %v3277_v46, %v2650_v30 }
  0x92   :  { %761 = vadd.xlane.f32.xlu0 %v760_v48  ;;  %v764_v49 = vadd.f32 %v763_v55, %v748_v8  ;;  %v800_v28 = vrot.slane %v3277_v46, %v2653_v31  ;;  %vm3327_vm15 = vcmp.eq.s32.totalorder %v784_v0, 1  ;;  %vm3331_vm0 = vcmp.eq.s32.totalorder %v788_v2, 1 }
  0x93   :  { %v750_v52 = vsel %vm3214_vm7, %v3303_v18, 0.0  ;;  %vm3338_vm2 = vcmp.eq.s32.totalorder %v792_v4, 1  ;;  %v3343_v44 = vsel %vm862_vm14, 1, %v4964_v38  ;;  %2471 = vpow2.f32 %v2429_v57 }
  0x94   :  { %v751_v3 = vsel %vm3229_vm8, %v3310_v50, 0.0  ;;  %v765_v13 = vadd.f32 %v764_v49, %v749_v43  ;;  %v804_v39 = vrot.slane %v3277_v46, %v2656_v32  ;;  %v821_v62 = vsel %vm3327_vm15, %v3192_v53, 0.0 }
  0x95   :  { %v752_v60 = vsel %vm3236_vm9, %v3316_v12, 0.0  ;;  %v753_v21 = vsel %vm3240_vm10, %v3318_v6, 0.0  ;;  %vm3359_vm1 = vcmp.eq.s32.totalorder %v796_v14, 1  ;;  %v822_v42 = vsel %vm3331_vm0, %v3194_v23, 0.0 }
  0x96   :  { %v766_v45 = vadd.f32 %v765_v13, %v750_v52  ;;  %v808_v47 = vrot.slane %v3277_v46, %v2663_v34  ;;  %vm3368_vm6 = vcmp.eq.s32.totalorder %v800_v28, 1  ;;  %v823_v20 = vsel %vm3338_vm2, %v3196_v10, 0.0 }
  0x97   :  { %v812_v19 = vrot.slane %v3277_v46, %v2674_v37  ;;  %v837_v27 = vadd.f32 %v822_v42, %v821_v62  ;;  %v829_v58 = vsel %vm3327_vm15, %v3285_v17, 0.0  ;;  %v830_v54 = vsel %vm3331_vm0, %v3287_v11, 0.0 }
  0x98   :  { %v767_v0 = vadd.f32 %v766_v45, %v751_v3  ;;  %vm3383_vm3 = vcmp.eq.s32.totalorder %v804_v39, 1  ;;  %v824_v9 = vsel %vm3359_vm1, %v3198_v16, 0.0  ;;  %v831_v46 = vsel %vm3338_vm2, %v3289_v61, 0.0 }
  0x99   :  { %v825_v22 = vsel %vm3368_vm6, %v3200_v5, 0.0  ;;  %v838_v2 = vadd.f32 %v837_v27, %v823_v20  ;;  %v832_v8 = vsel %vm3359_vm1, %v3291_v7, 0.0  ;;  %v846_v4 = vadd.f32 %v830_v54, %v829_v58 }
  0x9a   :  { %v768_v57 = vadd.f32 %v767_v0, %v752_v60  ;;  %v867_v48 = vrot.slane %v3343_v44, %v2638_v25  ;;  %v871_v55 = vrot.slane %v3343_v44, %v2641_v26  ;;  %v875_v43 = vrot.slane %v3343_v44, %v2647_v29 }
  0x9b   :  { %vm3405_vm4 = vcmp.eq.s32.totalorder %v808_v47, 1  ;;  %vm3409_vm5 = vcmp.eq.s32.totalorder %v812_v19, 1  ;;  %v839_v28 = vadd.f32 %v838_v2, %v824_v9  ;;  %v847_v35 = vadd.f32 %v846_v4, %v831_v46 }
  0x9c   :  { %v769_v24 = vadd.f32 %v768_v57, %v753_v21  ;;  %v826_v52 = vsel %vm3383_vm3, %v3202_v40, 0.0  ;;  %v833_v1 = vsel %vm3368_vm6, %v3303_v18, 0.0  ;;  %v879_v3 = vrot.slane %v3343_v44, %v2650_v30 }
  0x9d   :  { %v2472_v13 = vpop.eup %2471  ;;  %v840_v39 = vadd.f32 %v839_v28, %v825_v22  ;;  %v848_v62 = vadd.f32 %v847_v35, %v832_v8  ;;  %vm3421_vm7 = vcmp.eq.s32.totalorder %v867_v48, 1  ;;  %vm3425_vm8 = vcmp.eq.s32.totalorder %v871_v55, 1  ;;  %v3489_v28 = vld [vmem:[#allocation6 + $0x10] sm:$0xff] }
  0x9e   :  { %770 = vadd.xlane.f32.xlu1 %v769_v24  ;;  %v827_v51 = vsel %vm3405_vm4, %v3222_v59, 0.0  ;;  %v834_v42 = vsel %vm3383_vm3, %v3310_v50, 0.0  ;;  %v883_v45 = vrot.slane %v3343_v44, %v2653_v31  ;;  %vm3437_vm9 = vcmp.eq.s32.totalorder %v875_v43, 1 }
  0x9f   :  { %v828_v15 = vsel %vm3409_vm5, %v3224_v56, 0.0  ;;  %v841_v20 = vadd.f32 %v840_v39, %v826_v52  ;;  %v835_v19 = vsel %vm3405_vm4, %v3316_v12, 0.0  ;;  %v849_v27 = vadd.f32 %v848_v62, %v833_v1 }
  0xa0   :  { %v887_v58 = vrot.slane %v3343_v44, %v2656_v32  ;;  %vm3449_vm10 = vcmp.eq.s32.totalorder %v879_v3, 1  ;;  %v904_v0 = vsel %vm3421_vm7, %v3192_v53, 0.0  ;;  %v905_v36 = vsel %vm3425_vm8, %v3194_v23, 0.0 }
  0xa1   :  { %v842_v9 = vadd.f32 %v841_v20, %v827_v51  ;;  %v836_v46 = vsel %vm3409_vm5, %v3318_v6, 0.0  ;;  %v850_v22 = vadd.f32 %v849_v27, %v834_v42  ;;  %v906_v2 = vsel %vm3437_vm9, %v3196_v10, 0.0 }
  0xa2   :  { %v891_v8 = vrot.slane %v3343_v44, %v2663_v34  ;;  %vm3467_vm11 = vcmp.eq.s32.totalorder %v883_v45, 1  ;;  %v920_v53 = vadd.f32 %v905_v36, %v904_v0  ;;  %v912_v23 = vsel %vm3421_vm7, %v3285_v17, 0.0 }
  0xa3   :  { %v843_v57 = vadd.f32 %v842_v9, %v828_v15  ;;  %v851_v48 = vadd.f32 %v850_v22, %v835_v19  ;;  %v907_v55 = vsel %vm3449_vm10, %v3198_v16, 0.0  ;;  %v913_v10 = vsel %vm3425_vm8, %v3287_v11, 0.0 }
  0xa4   :  { %v895_v43 = vrot.slane %v3343_v44, %v2674_v37  ;;  %vm3482_vm13 = vcmp.eq.s32.totalorder %v887_v58, 1  ;;  %v921_v49 = vadd.f32 %v920_v53, %v906_v2  ;;  %v914_v17 = vsel %vm3437_vm9, %v3289_v61, 0.0 }
  0xa5   :  { %844 = vadd.xlane.f32.xlu0 %v843_v57  ;;  %v852_v16 = vadd.f32 %v851_v48, %v836_v46  ;;  %v908_v11 = vsel %vm3467_vm11, %v3200_v5, 0.0  ;;  %v929_v35 = vadd.f32 %v913_v10, %v912_v23  ;;  %vm3494_vm14 = vcmp.eq.s32.totalorder %v891_v8, 1 }
  0xa6   :  { %v922_v24 = vadd.f32 %v921_v49, %v907_v55  ;;  %v915_v52 = vsel %vm3449_vm10, %v3291_v7, 0.0  ;;  %v967_v1 = vadd.f32 1.0, %v2472_v13  ;;  %v909_v61 = vsel %vm3482_vm13, %v3202_v40, 0.0 }
  0xa7   :  { %853 = vadd.xlane.f32.xlu1 %v852_v16  ;;  %v930_v3 = vadd.f32 %v929_v35, %v914_v17  ;;  %vm1076_vm15 = vcmp.eq.s32.totalorder %v3489_v28, 0  ;;  %vm3505_vm0 = vcmp.eq.s32.totalorder %v895_v43, 1  ;;  %v916_v62 = vsel %vm3467_vm11, %v3303_v18, 0.0 }
  0xa8   :  { %v923_v39 = vadd.f32 %v922_v24, %v908_v11  ;;  %2473 = vrcp.f32 %v967_v1  ;;  %v910_v7 = vsel %vm3494_vm14, %v3222_v59, 0.0  ;;  %v917_v40 = vsel %vm3482_vm13, %v3310_v50, 0.0  ;;  %vm1135_vm2 = vmand %vm1076_vm15, %vm4963_vm12 }
  0xa9   :  { %v931_v13 = vadd.f32 %v930_v3, %v915_v52  ;;  %v911_v21 = vsel %vm3505_vm0, %v3224_v56, 0.0  ;;  %vm1217_vm1 = vcmp.eq.s32.totalorder %v3489_v28, 1  ;;  %v918_v59 = vsel %vm3494_vm14, %v3316_v12, 0.0 }
  0xaa   :  { %v924_v60 = vadd.f32 %v923_v39, %v909_v61  ;;  %v919_v50 = vsel %vm3505_vm0, %v3318_v6, 0.0  ;;  %v3531_v47 = vsel %vm1135_vm2, 1, %v4964_v38  ;;  %vm1218_vm6 = vmand %vm1217_vm1, %vm4963_vm12  ;;  %vm1300_vm10 = vcmp.eq.s32.totalorder %v3489_v28, 2 }
  0xab   :  { %v932_v51 = vadd.f32 %v931_v13, %v916_v62  ;;  %v1140_v20 = vrot.slane %v3531_v47, %v2638_v25  ;;  %v1144_v12 = vrot.slane %v3531_v47, %v2641_v26  ;;  %v3540_v19 = vsel %vm1218_vm6, 1, %v4964_v38  ;;  %vm1301_vm6 = vmand %vm1300_vm10, %vm4963_vm12 }
  0xac   :  { %v925_v18 = vadd.f32 %v924_v60, %v910_v7  ;;  %v1148_v6 = vrot.slane %v3531_v47, %v2647_v29  ;;  %v1152_v58 = vrot.slane %v3531_v47, %v2650_v30  ;;  %v1156_v0 = vrot.slane %v3531_v47, %v2653_v31 }
  0xad   :  { %v933_v42 = vadd.f32 %v932_v51, %v917_v40  ;;  %v1160_v36 = vrot.slane %v3531_v47, %v2656_v32  ;;  %v1164_v9 = vrot.slane %v3531_v47, %v2663_v34  ;;  %v1168_v46 = vrot.slane %v3531_v47, %v2674_v37 }
  0xae   :  { %v926_v45 = vadd.f32 %v925_v18, %v911_v21  ;;  %v1223_v22 = vrot.slane %v3540_v19, %v2638_v25  ;;  %v1227_v2 = vrot.slane %v3540_v19, %v2641_v26  ;;  %v1231_v8 = vrot.slane %v3540_v19, %v2647_v29 }
  0xaf   :  { %v934_v56 = vadd.f32 %v933_v42, %v918_v59  ;;  %vm3572_vm3 = vcmp.eq.s32.totalorder %v1140_v20, 1  ;;  %vm3576_vm4 = vcmp.eq.s32.totalorder %v1144_v12, 1  ;;  %vm3592_vm5 = vcmp.eq.s32.totalorder %v1148_v6, 1 }
  0xb0   :  { %927 = vadd.xlane.f32.xlu0 %v926_v45  ;;  %vm3596_vm7 = vcmp.eq.s32.totalorder %v1152_v58, 1  ;;  %vm3608_vm8 = vcmp.eq.s32.totalorder %v1156_v0, 1  ;;  %v1235_v13 = vrot.slane %v3540_v19, %v2650_v30  ;;  %v1239_v51 = vrot.slane %v3540_v19, %v2653_v31 }
  0xb1   :  { %v935_v15 = vadd.f32 %v934_v56, %v919_v50  ;;  %v1243_v45 = vrot.slane %v3540_v19, %v2656_v32  ;;  %vm3626_vm9 = vcmp.eq.s32.totalorder %v1160_v36, 1  ;;  %v1247_v20 = vrot.slane %v3540_v19, %v2663_v34 }
  0xb2   :  { %v2474_v27 = vpop.eup %2473  ;;  %vm3641_vm11 = vcmp.eq.s32.totalorder %v1164_v9, 1  ;;  %vm3655_vm13 = vcmp.eq.s32.totalorder %v1168_v46, 1  ;;  %vm3687_vm14 = vcmp.eq.s32.totalorder %v1223_v22, 1  ;;  %vm3694_vm15 = vcmp.eq.s32.totalorder %v1227_v2, 1 }
  0xb3   :  { %936 = vadd.xlane.f32.xlu1 %v935_v15  ;;  %v2430_v54 = vadd.f32 -0.0001, %v2474_v27  ;;  %vm3703_vm0 = vcmp.eq.s32.totalorder %v1231_v8, 1  ;;  %vm3709_vm2 = vcmp.eq.s32.totalorder %v1235_v13, 1  ;;  %vm3718_vm1 = vcmp.eq.s32.totalorder %v1239_v51, 1 }
  0xb4   :  { %vm3756_vm10 = vcmp.eq.s32.totalorder %v1247_v20, 1  ;;  %v3765_v48 = vsel %vm1301_vm6, 1, %v4964_v38 }
  0xb5   :  { %v3561_v4 = vrot.slane %v2430_v54, %v2638_v25  ;;  %v3564_v53 = vrot.slane %v2430_v54, %v2641_v26  ;;  %v3567_v23 = vrot.slane %v2430_v54, %v2647_v29  ;;  %v3570_v57 = vrot.slane %v2430_v54, %v2650_v30 }
  0xb6   :  { %v3581_v10 = vrot.slane %v2430_v54, %v2653_v31  ;;  %v3584_v43 = vrot.slane %v2430_v54, %v2656_v32  ;;  %v3587_v14 = vrot.slane %v2430_v54, %v2663_v34  ;;  %v3590_v49 = vrot.slane %v2430_v54, %v2674_v37 }
  0xb7   :  { %v1012_v11 = vsub.f32 %v3561_v4, %v2660_v33  ;;  %v1013_v35 = vsub.f32 %v3564_v53, %v2660_v33  ;;  %v1014_v44 = vsub.f32 %v3567_v23, %v2660_v33  ;;  %v1015_v24 = vsub.f32 %v3570_v57, %v2660_v33 }
  0xb8   :  { %v1016_v1 = vsub.f32 %v3581_v10, %v2660_v33  ;;  %v1017_v61 = vsub.f32 %v3584_v43, %v2660_v33  ;;  %v1018_v3 = vsub.f32 %v3587_v14, %v2660_v33  ;;  %v1019_v5 = vsub.f32 %v3590_v49, %v2660_v33 }
  0xb9   :  { %v1028_v39 = vand.u32 2147483647, %v1012_v11  ;;  %v1029_v62 = vand.u32 2147483647, %v1013_v35  ;;  %v1030_v7 = vand.u32 2147483647, %v1014_v44  ;;  %v1020_v58 = vsub.f32 %v3561_v4, %v4954_v41 }
  0xba   :  { %v1031_v60 = vand.u32 2147483647, %v1015_v24  ;;  %v1032_v40 = vand.u32 2147483647, %v1016_v1  ;;  %v1033_v21 = vand.u32 2147483647, %v1017_v61  ;;  %v1021_v35 = vsub.f32 %v3564_v53, %v4954_v41 }
  0xbb   :  { %v1034_v18 = vand.u32 2147483647, %v1018_v3  ;;  %v1035_v59 = vand.u32 2147483647, %v1019_v5  ;;  %v1044_v42 = vsub.f32 0.1, %v1028_v39  ;;  %v1022_v4 = vsub.f32 %v3567_v23, %v4954_v41 }
  0xbc   :  { %v1045_v50 = vsub.f32 0.1, %v1029_v62  ;;  %v1046_v47 = vsub.f32 0.1, %v1030_v7  ;;  %v1047_v56 = vsub.f32 0.1, %v1031_v60  ;;  %v1023_v1 = vsub.f32 %v3570_v57, %v4954_v41 }
  0xbd   :  { %v1048_v12 = vsub.f32 0.1, %v1032_v40  ;;  %v1049_v27 = vsub.f32 0.1, %v1033_v21  ;;  %v1050_v6 = vsub.f32 0.1, %v1034_v18  ;;  %v1024_v5 = vsub.f32 %v3581_v10, %v4954_v41 }
  0xbe   :  { %v3635_v54 = vmax.f32 %v1044_v42, 0.0  ;;  %v3637_v0 = vmax.f32 %v1045_v50, 0.0  ;;  %v3639_v11 = vmax.f32 %v1046_v47, 0.0  ;;  %v3647_v44 = vmax.f32 %v1047_v56, 0.0  ;;  %v1383_v18 = vld [vmem:[#allocation3 + $0x18] sm:$0xff] }
  0xbf   :  { %v3649_v24 = vmax.f32 %v1048_v12, 0.0  ;;  %v1051_v61 = vsub.f32 0.1, %v1035_v59  ;;  %v3667_v23 = vmax.f32 %v1049_v27, 0.0  ;;  %v3669_v39 = vmax.f32 %v1050_v6, 0.0 }
  0xc0   :  { %v1177_v9 = vsel %vm3572_vm3, %v3635_v54, 0.0  ;;  %v1178_v53 = vsel %vm3576_vm4, %v3637_v0, 0.0  ;;  %v1179_v46 = vsel %vm3592_vm5, %v3639_v11, 0.0  ;;  %v1180_v57 = vsel %vm3596_vm7, %v3647_v44, 0.0 }
  0xc1   :  { %v1181_v62 = vsel %vm3608_vm8, %v3649_v24, 0.0  ;;  %v1193_v7 = vadd.f32 %v1178_v53, %v1177_v9  ;;  %v1025_v10 = vsub.f32 %v3584_v43, %v4954_v41  ;;  %v1026_v60 = vsub.f32 %v3587_v14, %v4954_v41 }
  0xc2   :  { %v1027_v43 = vsub.f32 %v3590_v49, %v4954_v41  ;;  %v1036_v59 = vand.u32 2147483647, %v1020_v58  ;;  %v1037_v14 = vand.u32 2147483647, %v1021_v35  ;;  %v1038_v42 = vand.u32 2147483647, %v1022_v4 }
  0xc3   :  { %v1194_v50 = vadd.f32 %v1193_v7, %v1179_v46  ;;  %v1039_v47 = vand.u32 2147483647, %v1023_v1  ;;  %v1040_v2 = vand.u32 2147483647, %v1024_v5  ;;  %v1041_v56 = vand.u32 2147483647, %v1025_v10 }
  0xc4   :  { %v1042_v12 = vand.u32 2147483647, %v1026_v60  ;;  %v1043_v27 = vand.u32 2147483647, %v1027_v43  ;;  %v1052_v6 = vsub.f32 0.1, %v1036_v59  ;;  %v1251_v49 = vrot.slane %v3540_v19, %v2674_v37 }
  0xc5   :  { %v1195_v35 = vadd.f32 %v1194_v50, %v1180_v57  ;;  %v1053_v4 = vsub.f32 0.1, %v1037_v14  ;;  %v1054_v8 = vsub.f32 0.1, %v1038_v42  ;;  %v1055_v9 = vsub.f32 0.1, %v1039_v47 }
  0xc6   :  { %v3713_v53 = vmax.f32 %v1051_v61, 0.0  ;;  %v1182_v1 = vsel %vm3626_vm9, %v3667_v23, 0.0  ;;  %v1056_v5 = vsub.f32 0.1, %v1040_v2  ;;  %v5021_v46 = vmov 0 }
  0xc7   :  { %v5022_v46 = vsel %vm3718_vm1, 4294967295, %v5021_v46  ;;  %v2431_v7 = vmul.f32 -1.442695, %v1383_v18  ;;  %v1196_v13 = vadd.f32 %v1195_v35, %v1181_v62  ;;  %v1057_v10 = vsub.f32 0.1, %v1041_v56 }
  0xc8   :  { %v3722_v60 = vmax.f32 %v1052_v6, 0.0  ;;  %v3724_v57 = vmax.f32 %v1053_v4, 0.0  ;;  %v1183_v61 = vsel %vm3641_vm11, %v3669_v39, 0.0  ;;  %v1058_v51 = vsub.f32 0.1, %v1042_v12 }
  0xc9   :  { %v3733_v43 = vmax.f32 %v1054_v8, 0.0  ;;  %vm3738_vm1 = vcmp.eq.s32.totalorder %v1243_v45, 1  ;;  %v1197_v18 = vadd.f32 %v1196_v13, %v1182_v1  ;;  %v1059_v59 = vsub.f32 0.1, %v1043_v27 }
  0xca   :  { %v3742_v14 = vmax.f32 %v1055_v9, 0.0  ;;  %v1185_v28 = vsel %vm3572_vm3, %v3722_v60, 0.0  ;;  %v1184_v42 = vsel %vm3655_vm13, %v3713_v53, 0.0  ;;  %v1186_v50 = vsel %vm3576_vm4, %v3724_v57, 0.0 }
  0xcb   :  { %vm3760_vm12 = vcmp.eq.s32.totalorder %v1251_v49, 1  ;;  %2475 = vpow2.f32 %v2431_v7  ;;  %v1198_v2 = vadd.f32 %v1197_v18, %v1183_v61  ;;  %v3767_v56 = vmax.f32 %v1056_v5, 0.0 }
  0xcc   :  { %v3769_v55 = vmax.f32 %v1057_v10, 0.0  ;;  %v1187_v19 = vsel %vm3592_vm5, %v3733_v43, 0.0  ;;  %v3774_v20 = vmax.f32 %v1058_v51, 0.0  ;;  %v1202_v12 = vadd.f32 %v1186_v50, %v1185_v28 }
  0xcd   :  { %v1260_v27 = vsel %vm3687_vm14, %v3635_v54, 0.0  ;;  %v1261_v6 = vsel %vm3694_vm15, %v3637_v0, 0.0  ;;  %v1199_v49 = vadd.f32 %v1198_v2, %v1184_v42  ;;  %v3782_v35 = vmax.f32 %v1059_v59, 0.0 }
  0xce   :  { %v1188_v4 = vsel %vm3596_vm7, %v3742_v14, 0.0  ;;  %v1262_v17 = vsel %vm3703_vm0, %v3639_v11, 0.0  ;;  %v1203_v8 = vadd.f32 %v1202_v12, %v1187_v19  ;;  %v1276_v9 = vadd.f32 %v1261_v6, %v1260_v27 }
  0xcf   :  { %v1306_v1 = vrot.slane %v3765_v48, %v2638_v25  ;;  %v1310_v5 = vrot.slane %v3765_v48, %v2641_v26  ;;  %1200 = vadd.xlane.f32.xlu0 %v1199_v49  ;;  %v1189_v7 = vsel %vm3608_vm8, %v3767_v56, 0.0  ;;  %v1263_v16 = vsel %vm3709_vm2, %v3647_v44, 0.0 }
  0xd0   :  { %v1268_v13 = vsel %vm3687_vm14, %v3722_v60, 0.0  ;;  %v1269_v10 = vsel %vm3694_vm15, %v3724_v57, 0.0  ;;  %v1190_v61 = vsel %vm3626_vm9, %v3769_v55, 0.0  ;;  %v1204_v51 = vadd.f32 %v1203_v8, %v1188_v4 }
  0xd1   :  { %v1277_v18 = vadd.f32 %v1276_v9, %v1262_v17  ;;  %v1270_v52 = vsel %vm3703_vm0, %v3733_v43, 0.0  ;;  %v1191_v59 = vsel %vm3641_vm11, %v3774_v20, 0.0  ;;  %v1192_v40 = vsel %vm3655_vm13, %v3782_v35, 0.0 }
  0xd2   :  { %vm5029_vm3 = vnez %v5022_v46  ;;  %v1285_v15 = vadd.f32 %v1269_v10, %v1268_v13  ;;  %v1205_v28 = vadd.f32 %v1204_v51, %v1189_v7  ;;  %v1271_v22 = vsel %vm3709_vm2, %v3742_v14, 0.0 }
  0xd3   :  { %v1264_v21 = vsel %vm5029_vm3, %v3649_v24, 0.0  ;;  %v1278_v42 = vadd.f32 %v1277_v18, %v1263_v16  ;;  %v1314_v50 = vrot.slane %v3765_v48, %v2647_v29  ;;  %v1265_v36 = vsel %vm3738_vm1, %v3667_v23, 0.0 }
  0xd4   :  { %v1272_v3 = vsel %vm5029_vm3, %v3767_v56, 0.0  ;;  %v1286_v2 = vadd.f32 %v1285_v15, %v1270_v52  ;;  %v1318_v19 = vrot.slane %v3765_v48, %v2650_v30  ;;  %v1206_v27 = vadd.f32 %v1205_v28, %v1190_v61 }
  0xd5   :  { %v2476_v12 = vpop.eup %2475  ;;  %v1279_v6 = vadd.f32 %v1278_v42, %v1264_v21  ;;  %vm3834_vm4 = vcmp.eq.s32.totalorder %v1306_v1, 1  ;;  %vm3838_vm5 = vcmp.eq.s32.totalorder %v1310_v5, 1  ;;  %v1266_v46 = vsel %vm3756_vm10, %v3669_v39, 0.0 }
  0xd6   :  { %v1267_v4 = vsel %vm3760_vm12, %v3713_v53, 0.0  ;;  %v1273_v17 = vsel %vm3738_vm1, %v3769_v55, 0.0  ;;  %v1287_v8 = vadd.f32 %v1286_v2, %v1271_v22  ;;  %v1207_v9 = vadd.f32 %v1206_v27, %v1191_v59  ;;  %v1384_v22 = vld [vmem:[#allocation6 + $0x18] sm:$0xff] }
  0xd7   :  { %v1280_v1 = vadd.f32 %v1279_v6, %v1265_v36  ;;  %v1322_v5 = vrot.slane %v3765_v48, %v2653_v31  ;;  %vm3853_vm7 = vcmp.eq.s32.totalorder %v1314_v50, 1  ;;  %v1274_v16 = vsel %vm3756_vm10, %v3774_v20, 0.0 }
  0xd8   :  { %v1288_v13 = vadd.f32 %v1287_v8, %v1272_v3  ;;  %v1343_v62 = vsel %vm3834_vm4, %v3635_v54, 0.0  ;;  %v1344_v10 = vsel %vm3838_vm5, %v3637_v0, 0.0  ;;  %v1208_v61 = vadd.f32 %v1207_v9, %v1192_v40  ;;  %v1822_v8 = vld [vmem:[#allocation3 + $0x20] sm:$0xff] }
  0xd9   :  { %v1281_v51 = vadd.f32 %v1280_v1, %v1266_v46  ;;  %v1326_v18 = vrot.slane %v3765_v48, %v2656_v32  ;;  %vm3868_vm8 = vcmp.eq.s32.totalorder %v1318_v19, 1  ;;  %v1275_v45 = vsel %vm3760_vm12, %v3782_v35, 0.0 }
  0xda   :  { %v1289_v59 = vadd.f32 %v1288_v13, %v1273_v17  ;;  %v1330_v54 = vrot.slane %v3765_v48, %v2663_v34  ;;  %v1345_v0 = vsel %vm3853_vm7, %v3639_v11, 0.0  ;;  %1209 = vadd.xlane.f32.xlu1 %v1208_v61  ;;  %vm3880_vm9 = vcmp.eq.s32.totalorder %v1322_v5, 1 }
  0xdb   :  { %v1282_v40 = vadd.f32 %v1281_v51, %v1267_v4  ;;  %v1359_v15 = vadd.f32 %v1344_v10, %v1343_v62  ;;  %v1351_v47 = vsel %vm3834_vm4, %v3722_v60, 0.0  ;;  %v1346_v42 = vsel %vm3868_vm8, %v3647_v44, 0.0 }
  0xdc   :  { %v1290_v28 = vadd.f32 %v1289_v59, %v1274_v16  ;;  %v1352_v11 = vsel %vm3838_vm5, %v3724_v57, 0.0  ;;  %v1334_v50 = vrot.slane %v3765_v48, %v2674_v37  ;;  %vm3895_vm12 = vcmp.eq.s32.totalorder %v1326_v18, 1 }
  0xdd   :  { %1283 = vadd.xlane.f32.xlu0 %v1282_v40  ;;  %v1360_v3 = vadd.f32 %v1359_v15, %v1345_v0  ;;  %v1353_v60 = vsel %vm3853_vm7, %v3733_v43, 0.0  ;;  %v1347_v44 = vsel %vm3880_vm9, %v3649_v24, 0.0  ;;  %v1368_v57 = vadd.f32 %v1352_v11, %v1351_v47 }
  0xde   :  { %v1291_v2 = vadd.f32 %v1290_v28, %v1275_v45  ;;  %v1406_v19 = vadd.f32 1.0, %v2476_v12  ;;  %vm3905_vm11 = vcmp.eq.s32.totalorder %v1330_v54, 1  ;;  %v1354_v6 = vsel %vm3868_vm8, %v3742_v14, 0.0 }
  0xdf   :  { %v1361_v48 = vadd.f32 %v1360_v3, %v1346_v42  ;;  %vm1515_vm13 = vcmp.eq.s32.totalorder %v1384_v22, 0  ;;  %v1348_v43 = vsel %vm3895_vm12, %v3667_v23, 0.0  ;;  %v1369_v58 = vadd.f32 %v1368_v57, %v1353_v60 }
  0xe0   :  { %1292 = vadd.xlane.f32.xlu1 %v1291_v2  ;;  %2477 = vrcp.f32 %v1406_v19  ;;  %vm3915_vm14 = vcmp.eq.s32.totalorder %v1334_v50, 1  ;;  %v1355_v49 = vsel %vm3880_vm9, %v3767_v56, 0.0  ;;  %vm1656_vm15 = vcmp.eq.s32.totalorder %v1384_v22, 1 }
  0xe1   :  { %v1362_v12 = vadd.f32 %v1361_v48, %v1347_v44  ;;  %v1349_v14 = vsel %vm3905_vm11, %v3669_v39, 0.0  ;;  %v1370_v46 = vadd.f32 %v1369_v58, %v1354_v6  ;;  %vm5046_vm0 = vnez %v4962_v63 }
  0xe2   :  { %vm1574_vm2 = vmand %vm1515_vm13, %vm5046_vm0  ;;  %vm1739_vm1 = vcmp.eq.s32.totalorder %v1384_v22, 2  ;;  %v1356_v4 = vsel %vm3895_vm12, %v3769_v55, 0.0  ;;  %v1350_v17 = vsel %vm3915_vm14, %v3713_v53, 0.0  ;;  %v1357_v9 = vsel %vm3905_vm11, %v3774_v20, 0.0 }
  0xe3   :  { %v1363_v23 = vadd.f32 %v1362_v12, %v1348_v43  ;;  %v1371_v56 = vadd.f32 %v1370_v46, %v1355_v49  ;;  %vm1657_vm6 = vmand %vm1656_vm15, %vm5046_vm0  ;;  %v3939_v1 = vsel %vm1574_vm2, 1, %v4964_v38  ;;  %v5047_v5 = vlaneseq }
  0xe4   :  { %vm1740_vm10 = vmand %vm1739_vm1, %vm5046_vm0  ;;  %v1358_v16 = vsel %vm3915_vm14, %v3782_v35, 0.0  ;;  %v3950_v13 = vsel %vm1657_vm6, 1, %v4964_v38  ;;  %v3952_v62 = vmul.f32 -1.442695, %v1822_v8  ;;  %v1579_v10 = vrot.slane %v3939_v1, %v2638_v25 }
  0xe5   :  { %v1364_v39 = vadd.f32 %v1363_v23, %v1349_v14  ;;  %v1372_v55 = vadd.f32 %v1371_v56, %v1356_v4  ;;  %v3944_v7 = vand.u32 127, %v5047_v5  ;;  %v1583_v63 = vrot.slane %v3939_v1, %v2641_v26 }
  0xe6   :  { %v3959_v61 = vsel %vm1740_vm10, 1, %v4964_v38  ;;  %v1587_v51 = vrot.slane %v3939_v1, %v2647_v29  ;;  %v1591_v35 = vrot.slane %v3939_v1, %v2650_v30  ;;  %v1595_v18 = vrot.slane %v3939_v1, %v2653_v31 }
  0xe7   :  { %v1365_v53 = vadd.f32 %v1364_v39, %v1350_v17  ;;  %v1373_v20 = vadd.f32 %v1372_v55, %v1357_v9  ;;  %v1599_v52 = vrot.slane %v3939_v1, %v2656_v32  ;;  %v1603_v54 = vrot.slane %v3939_v1, %v2663_v34 }
  0xe8   :  { %v1607_v0 = vrot.slane %v3939_v1, %v2674_v37  ;;  %v1662_v40 = vrot.slane %v3950_v13, %v2638_v25  ;;  %v1666_v15 = vrot.slane %v3950_v13, %v2641_v26  ;;  %v1670_v47 = vrot.slane %v3950_v13, %v2647_v29 }
  0xe9   :  { %1366 = vadd.xlane.f32.xlu0 %v1365_v53  ;;  %v1374_v59 = vadd.f32 %v1373_v20, %v1358_v16  ;;  %v1674_v28 = vrot.slane %v3950_v13, %v2650_v30  ;;  %v1678_v42 = vrot.slane %v3950_v13, %v2653_v31  ;;  %v1682_v11 = vrot.slane %v3950_v13, %v2656_v32 }
  0xea   :  { %v2478_v45 = vpop.eup %2477  ;;  %v1686_v22 = vrot.slane %v3950_v13, %v2663_v34  ;;  %v1690_v50 = vrot.slane %v3950_v13, %v2674_v37  ;;  %vm4001_vm3 = vcmp.eq.s32.totalorder %v1579_v10, 1  ;;  %vm4005_vm4 = vcmp.eq.s32.totalorder %v1583_v63, 1 }
  0xeb   :  { %v2432_v21 = vadd.f32 -0.0001, %v2478_v45  ;;  %1375 = vadd.xlane.f32.xlu1 %v1374_v59  ;;  %vm4021_vm5 = vcmp.eq.s32.totalorder %v1587_v51, 1  ;;  %vm4025_vm7 = vcmp.eq.s32.totalorder %v1591_v35, 1  ;;  %vm4037_vm8 = vcmp.eq.s32.totalorder %v1595_v18, 1 }
  0xec   :  { %v1745_v1 = vrot.slane %v3959_v61, %v2638_v25  ;;  %vm4055_vm9 = vcmp.eq.s32.totalorder %v1599_v52, 1  ;;  %vm4069_vm12 = vcmp.eq.s32.totalorder %v1603_v54, 1  ;;  %vm4083_vm11 = vcmp.eq.s32.totalorder %v1607_v0, 1 }
  0xed   :  { %v3990_v36 = vrot.slane %v2432_v21, %v2638_v25  ;;  %v3993_v3 = vrot.slane %v2432_v21, %v2641_v26  ;;  %v3996_v60 = vrot.slane %v2432_v21, %v2647_v29  ;;  %v3999_v2 = vrot.slane %v2432_v21, %v2650_v30 }
  0xee   :  { %v4010_v19 = vrot.slane %v2432_v21, %v2653_v31  ;;  %v4013_v27 = vrot.slane %v2432_v21, %v2656_v32  ;;  %v4016_v48 = vrot.slane %v2432_v21, %v2663_v34  ;;  %v4019_v6 = vrot.slane %v2432_v21, %v2674_v37 }
  0xef   :  { %v1451_v24 = vsub.f32 %v3990_v36, %v2660_v33  ;;  %v1452_v12 = vsub.f32 %v3993_v3, %v2660_v33  ;;  %v1453_v49 = vsub.f32 %v3996_v60, %v2660_v33  ;;  %v1454_v14 = vsub.f32 %v3999_v2, %v2660_v33 }
  0xf0   :  { %v1455_v23 = vsub.f32 %v4010_v19, %v2660_v33  ;;  %v1456_v4 = vsub.f32 %v4013_v27, %v2660_v33  ;;  %v1457_v17 = vsub.f32 %v4016_v48, %v2660_v33  ;;  %v1458_v56 = vsub.f32 %v4019_v6, %v2660_v33 }
  0xf1   :  { %v1467_v8 = vand.u32 2147483647, %v1451_v24  ;;  %v1468_v39 = vand.u32 2147483647, %v1452_v12  ;;  %v1469_v9 = vand.u32 2147483647, %v1453_v49  ;;  %2479 = vpow2.f32 %v3952_v62 }
  0xf2   :  { %v1470_v55 = vand.u32 2147483647, %v1454_v14  ;;  %v1471_v5 = vand.u32 2147483647, %v1455_v23  ;;  %v1472_v53 = vand.u32 2147483647, %v1456_v4  ;;  %v1459_v14 = vsub.f32 %v3990_v36, %v4954_v41 }
  0xf3   :  { %v1473_v20 = vand.u32 2147483647, %v1457_v17  ;;  %v1474_v10 = vand.u32 2147483647, %v1458_v56  ;;  %v1483_v63 = vsub.f32 0.1, %v1467_v8  ;;  %v1460_v56 = vsub.f32 %v3993_v3, %v4954_v41 }
  0xf4   :  { %v1484_v35 = vsub.f32 0.1, %v1468_v39  ;;  %v1485_v18 = vsub.f32 0.1, %v1469_v9  ;;  %v1486_v45 = vsub.f32 0.1, %v1470_v55  ;;  %v1461_v36 = vsub.f32 %v3996_v60, %v4954_v41 }
  0xf5   :  { %v1487_v24 = vsub.f32 0.1, %v1471_v5  ;;  %v1488_v12 = vsub.f32 0.1, %v1472_v53  ;;  %v1489_v49 = vsub.f32 0.1, %v1473_v20  ;;  %v1462_v9 = vsub.f32 %v3999_v2, %v4954_v41 }
  0xf6   :  { %v4063_v23 = vmax.f32 %v1483_v63, 0.0  ;;  %v4065_v4 = vmax.f32 %v1484_v35, 0.0  ;;  %v4067_v17 = vmax.f32 %v1485_v18, 0.0  ;;  %v4075_v8 = vmax.f32 %v1486_v45, 0.0 }
  0xf7   :  { %v4077_v39 = vmax.f32 %v1487_v24, 0.0  ;;  %v1490_v55 = vsub.f32 0.1, %v1474_v10  ;;  %v1463_v53 = vsub.f32 %v4010_v19, %v4954_v41  ;;  %v4095_v60 = vmax.f32 %v1488_v12, 0.0 }
  0xf8   :  { %v1616_v54 = vsel %vm4001_vm3, %v4063_v23, 0.0  ;;  %v1617_v3 = vsel %vm4005_vm4, %v4065_v4, 0.0  ;;  %v4097_v20 = vmax.f32 %v1489_v49, 0.0  ;;  %v1618_v0 = vsel %vm4021_vm5, %v4067_v17, 0.0 }
  0xf9   :  { %v1619_v2 = vsel %vm4025_vm7, %v4075_v8, 0.0  ;;  %v1620_v10 = vsel %vm4037_vm8, %v4077_v39, 0.0  ;;  %v1632_v63 = vadd.f32 %v1617_v3, %v1616_v54  ;;  %v1464_v19 = vsub.f32 %v4013_v27, %v4954_v41 }
  0xfa   :  { %v1465_v35 = vsub.f32 %v4016_v48, %v4954_v41  ;;  %vm4115_vm13 = vcmp.eq.s32.totalorder %v1662_v40, 1  ;;  %vm4122_vm14 = vcmp.eq.s32.totalorder %v1666_v15, 1  ;;  %v1466_v27 = vsub.f32 %v4019_v6, %v4954_v41 }
  0xfb   :  { %v1475_v24 = vand.u32 2147483647, %v1459_v14  ;;  %v1476_v12 = vand.u32 2147483647, %v1460_v56  ;;  %v1477_v48 = vand.u32 2147483647, %v1461_v36  ;;  %v1633_v49 = vadd.f32 %v1632_v63, %v1618_v0 }
  0xfc   :  { %vm4131_vm15 = vcmp.eq.s32.totalorder %v1670_v47, 1  ;;  %v1478_v54 = vand.u32 2147483647, %v1462_v9  ;;  %v1479_v3 = vand.u32 2147483647, %v1463_v53  ;;  %vm4138_vm0 = vcmp.eq.s32.totalorder %v1674_v28, 1 }
  0xfd   :  { %v1480_v15 = vand.u32 2147483647, %v1464_v19  ;;  %v1481_v21 = vand.u32 2147483647, %v1465_v35  ;;  %v1482_v51 = vand.u32 2147483647, %v1466_v27  ;;  %v1761_v47 = vrot.slane %v3959_v61, %v2653_v31 }
  0xfe   :  { %v1491_v16 = vsub.f32 0.1, %v1475_v24  ;;  %v1634_v14 = vadd.f32 %v1633_v49, %v1619_v2  ;;  %v1492_v56 = vsub.f32 0.1, %v1476_v12  ;;  %v1493_v36 = vsub.f32 0.1, %v1477_v48 }
  0xff   :  { %v1494_v0 = vsub.f32 0.1, %v1478_v54  ;;  %v4144_v9 = vmax.f32 %v1490_v55, 0.0  ;;  %v1621_v53 = vsel %vm4055_vm9, %v4095_v60, 0.0  ;;  %v1495_v63 = vsub.f32 0.1, %v1479_v3 }
 0x100   :  { %v1496_v19 = vsub.f32 0.1, %v1480_v15  ;;  %vm4152_vm2 = vcmp.eq.s32.totalorder %v1678_v42, 1  ;;  %vm4159_vm1 = vcmp.eq.s32.totalorder %v1682_v11, 1  ;;  %v1635_v55 = vadd.f32 %v1634_v14, %v1620_v10 }
 0x101   :  { %v1497_v35 = vsub.f32 0.1, %v1481_v21  ;;  %v4163_v27 = vmax.f32 %v1491_v16, 0.0  ;;  %v4165_v24 = vmax.f32 %v1492_v56, 0.0  ;;  %v1622_v42 = vsel %vm4069_vm12, %v4097_v20, 0.0 }
 0x102   :  { %v1498_v12 = vsub.f32 0.1, %v1482_v51  ;;  %v4170_v48 = vmax.f32 %v1493_v36, 0.0  ;;  %vm4175_vm6 = vcmp.eq.s32.totalorder %v1686_v22, 1  ;;  %vm4182_vm10 = vcmp.eq.s32.totalorder %v1690_v50, 1 }
 0x103   :  { %v1765_v21 = vrot.slane %v3959_v61, %v2656_v32  ;;  %v1636_v51 = vadd.f32 %v1635_v55, %v1621_v53  ;;  %v4188_v10 = vmax.f32 %v1494_v0, 0.0  ;;  %v1624_v22 = vsel %vm4001_vm3, %v4163_v27, 0.0 }
 0x104   :  { %v1769_v49 = vrot.slane %v3959_v61, %v2663_v34  ;;  %v1623_v13 = vsel %vm4083_vm11, %v4144_v9, 0.0  ;;  %v4198_v50 = vmax.f32 %v1495_v63, 0.0  ;;  %v4200_v54 = vmax.f32 %v1496_v19, 0.0 }
 0x105   :  { %v1625_v3 = vsel %vm4005_vm4, %v4165_v24, 0.0  ;;  %v1637_v15 = vadd.f32 %v1636_v51, %v1622_v42  ;;  %v4205_v14 = vmax.f32 %v1497_v35, 0.0  ;;  %v1626_v44 = vsel %vm4021_vm5, %v4170_v48, 0.0 }
 0x106   :  { %v1773_v56 = vrot.slane %v3959_v61, %v2674_v37  ;;  %v4212_v36 = vmax.f32 %v1498_v12, 0.0  ;;  %v1641_v0 = vadd.f32 %v1625_v3, %v1624_v22  ;;  %v1699_v53 = vsel %vm4115_vm13, %v4063_v23, 0.0 }
 0x107   :  { %v1700_v57 = vsel %vm4122_vm14, %v4065_v4, 0.0  ;;  %v1638_v63 = vadd.f32 %v1637_v15, %v1623_v13  ;;  %v1627_v43 = vsel %vm4025_vm7, %v4188_v10, 0.0  ;;  %v1701_v19 = vsel %vm4131_vm15, %v4067_v17, 0.0 }
 0x108   :  { %v1628_v55 = vsel %vm4037_vm8, %v4198_v50, 0.0  ;;  %v1629_v35 = vsel %vm4055_vm9, %v4200_v54, 0.0  ;;  %v1642_v42 = vadd.f32 %v1641_v0, %v1626_v44  ;;  %v1715_v12 = vadd.f32 %v1700_v57, %v1699_v53 }
 0x109   :  { %1639 = vadd.xlane.f32.xlu0 %v1638_v63  ;;  %v1630_v58 = vsel %vm4069_vm12, %v4205_v14, 0.0  ;;  %v1702_v51 = vsel %vm4138_vm0, %v4075_v8, 0.0  ;;  %v1707_v62 = vsel %vm4115_vm13, %v4163_v27, 0.0  ;;  %v1708_v46 = vsel %vm4122_vm14, %v4165_v24, 0.0 }
 0x10a   :  { %v1631_v59 = vsel %vm4083_vm11, %v4212_v36, 0.0  ;;  %v1643_v22 = vadd.f32 %v1642_v42, %v1627_v43  ;;  %v1716_v13 = vadd.f32 %v1715_v12, %v1701_v19  ;;  %v1709_v52 = vsel %vm4131_vm15, %v4170_v48, 0.0 }
 0x10b   :  { %v1703_v3 = vsel %vm4152_vm2, %v4077_v39, 0.0  ;;  %v1704_v18 = vsel %vm4159_vm1, %v4095_v60, 0.0  ;;  %v1710_v45 = vsel %vm4138_vm0, %v4188_v10, 0.0  ;;  %v1724_v5 = vadd.f32 %v1708_v46, %v1707_v62 }
 0x10c   :  { %v1644_v15 = vadd.f32 %v1643_v22, %v1628_v55  ;;  %v1717_v44 = vadd.f32 %v1716_v13, %v1702_v51  ;;  %vm4263_vm3 = vcmp.eq.s32.totalorder %v1745_v1, 1  ;;  %v5082_v0 = vrot.slane %v3959_v61, %v2641_v26 }
 0x10d   :  { %v1705_v6 = vsel %vm4175_vm6, %v4097_v20, 0.0  ;;  %v1706_v57 = vsel %vm4182_vm10, %v4144_v9, 0.0  ;;  %v1711_v1 = vsel %vm4152_vm2, %v4198_v50, 0.0  ;;  %v1725_v63 = vadd.f32 %v1724_v5, %v1709_v52  ;;  %v2480_v52 = vpop.eup %2479 }
 0x10e   :  { %vm4270_vm4 = vcmp.eq.s32.totalorder %v5082_v0, 1  ;;  %v1645_v43 = vadd.f32 %v1644_v15, %v1629_v35  ;;  %v1718_v19 = vadd.f32 %v1717_v44, %v1703_v3  ;;  %v1712_v55 = vsel %vm4159_vm1, %v4200_v54, 0.0 }
 0x10f   :  { %v5085_v42 = vrot.slane %v3959_v61, %v2647_v29  ;;  %v1713_v51 = vsel %vm4175_vm6, %v4205_v14, 0.0  ;;  %v1726_v28 = vadd.f32 %v1725_v63, %v1710_v45  ;;  %v1782_v35 = vsel %vm4263_vm3, %v4063_v23, 0.0 }
 0x110   :  { %v1783_v2 = vsel %vm4270_vm4, %v4065_v4, 0.0  ;;  %v1646_v62 = vadd.f32 %v1645_v43, %v1630_v58  ;;  %v1719_v46 = vadd.f32 %v1718_v19, %v1704_v18  ;;  %v1714_v22 = vsel %vm4182_vm10, %v4212_v36, 0.0 }
 0x111   :  { %vm4289_vm5 = vcmp.eq.s32.totalorder %v5085_v42, 1  ;;  %v5088_v13 = vrot.slane %v3959_v61, %v2650_v30  ;;  %v1727_v3 = vadd.f32 %v1726_v28, %v1711_v1  ;;  %vm4315_vm8 = vcmp.eq.s32.totalorder %v1761_v47, 1 }
 0x112   :  { %vm4319_vm9 = vcmp.eq.s32.totalorder %v1765_v21, 1  ;;  %v1784_v16 = vsel %vm4289_vm5, %v4067_v17, 0.0  ;;  %v1647_v58 = vadd.f32 %v1646_v62, %v1631_v59  ;;  %v1720_v18 = vadd.f32 %v1719_v46, %v1705_v6 }
 0x113   :  { %vm4308_vm7 = vcmp.eq.s32.totalorder %v5088_v13, 1  ;;  %v1798_v45 = vadd.f32 %v1783_v2, %v1782_v35  ;;  %v1790_v5 = vsel %vm4263_vm3, %v4163_v27, 0.0  ;;  %v1728_v15 = vadd.f32 %v1727_v3, %v1712_v55 }
 0x114   :  { %vm4332_vm12 = vcmp.eq.s32.totalorder %v1769_v49, 1  ;;  %v1785_v21 = vsel %vm4308_vm7, %v4075_v8, 0.0  ;;  %v1791_v17 = vsel %vm4270_vm4, %v4165_v24, 0.0  ;;  %1648 = vadd.xlane.f32.xlu1 %v1647_v58  ;;  %v1721_v59 = vadd.f32 %v1720_v18, %v1706_v57 }
 0x115   :  { %vm4342_vm11 = vcmp.eq.s32.totalorder %v1773_v56, 1  ;;  %v1799_v44 = vadd.f32 %v1798_v45, %v1784_v16  ;;  %v1792_v61 = vsel %vm4289_vm5, %v4170_v48, 0.0  ;;  %v1729_v49 = vadd.f32 %v1728_v15, %v1713_v51 }
 0x116   :  { %v1786_v8 = vsel %vm4315_vm8, %v4077_v39, 0.0  ;;  %v1787_v24 = vsel %vm4319_vm9, %v4095_v60, 0.0  ;;  %v1807_v40 = vadd.f32 %v1791_v17, %v1790_v5  ;;  %1722 = vadd.xlane.f32.xlu0 %v1721_v59  ;;  %v1793_v0 = vsel %vm4308_vm7, %v4188_v10, 0.0  ;;  %v320_v60 = vpop.xlane.xlu0 %319 }
 0x117   :  { %v1800_v56 = vadd.f32 %v1799_v44, %v1785_v21  ;;  %v62_v53 = vadd.s32 896, %v3944_v7  ;;  %v1845_v6 = vadd.f32 1.0, %v2480_v52  ;;  %v1730_v48 = vadd.f32 %v1729_v49, %v1714_v22  ;;  %v5100_v22 = vld [vmem:[#allocation13_spill] sm:$0xff]  ;;  %v5101_v52 = vld [vmem:[#allocation14_spill] sm:$0xff] }
 0x118   :  { %v1794_v57 = vsel %vm4315_vm8, %v4198_v50, 0.0  ;;  %v1808_v39 = vadd.f32 %v1807_v40, %v1792_v61  ;;  %vm40_vm13 = vcmask 64512   ;;  %v1788_v43 = vsel %vm4332_vm12, %v4097_v20, 0.0 }
 0x119   :  { %v1801_v1 = vadd.f32 %v1800_v56, %v1786_v8  ;;  %v1833_v63 = vadd.s32 4096, %v62_v53  ;;  %2481 = vrcp.f32 %v1845_v6  ;;  %1731 = vadd.xlane.f32.xlu1 %v1730_v48  ;;  %v2562_v19 = vmov 0.0   ;;  %v4428_v6 = vld [vmem:[#allocation6 + $0x20] sm:$0xff] }
 0x11a   :  { %v1809_v10 = vadd.f32 %v1808_v39, %v1793_v0  ;;  %41 = vst.msk [vmem:[#allocation2] sm:$0xff] %vm40_vm13, %v2562_v19  ;;  %42 = vst.msk [vmem:[#allocation2 + $0x8] sm:$0xff] %vm40_vm13, %v2562_v19  ;;  %v1795_v55 = vsel %vm4319_vm9, %v4200_v54, 0.0  ;;  %v1789_v42 = vsel %vm4342_vm11, %v4144_v9, 0.0  ;;  %v1796_v28 = vsel %vm4332_vm12, %v4205_v14, 0.0  ;;  %v329_v11 = vpop.xlane.xlu0 %328 }
 0x11b   :  { %v1802_v50 = vadd.f32 %v1801_v1, %v1787_v24  ;;  %vm1841_vm14 = vcmp.lt.s32.totalorder %v1833_v63, 5000  ;;  %v5099_v35 = vmov 1   ;;  %v1797_v54 = vsel %vm4342_vm11, %v4212_v36, 0.0 }
 0x11c   :  { %v1810_v12 = vadd.f32 %v1809_v10, %v1794_v57  ;;  %v1962_v20 = vsel %vm1841_vm14, 1, %v4964_v38  ;;  %vm334_vm15 = vcmask 7168   ;;  %vm1954_vm0 = vcmp.eq.s32.totalorder %v4428_v6, 0 }
 0x11d   :  { %v1803_v51 = vadd.f32 %v1802_v50, %v1788_v43  ;;  %v1966_v2 = vcombine.low %v5099_v35, %v1962_v20  ;;  %v5102_v20 = vld [vmem:[#allocation15_spill] sm:$0xff]  ;;  %vm418_vm2 = vcmask 15368   ;;  %vm2095_vm10 = vcmp.eq.s32.totalorder %v4428_v6, 1 }
 0x11e   :  { %v1811_v62 = vadd.f32 %v1810_v12, %v1795_v55 }
 0x11f   :  { %v1804_v46 = vadd.f32 %v1803_v51, %v1789_v42  ;;  %v1994_v13 = vrot.slane %v1966_v2, %v5100_v22 }
 0x120   :  { %v1812_v9 = vadd.f32 %v1811_v62, %v1796_v28 }
 0x121   :  { %1805 = vadd.xlane.f32.xlu0 %v1804_v46  ;;  %v1996_v3 = vcombine.low %v5101_v52, %v1994_v13  ;;  %v330_v23 = vld [vmem:[#allocation2] sm:$0xff]  ;;  %v331_v4 = vld [vmem:[#allocation2 + $0x8] sm:$0xff] }
 0x122   :  { %v1813_v16 = vadd.f32 %v1812_v9, %v1797_v54  ;;  %v332_v14 = vadd.f32 %v330_v23, %v320_v60  ;;  %v333_v58 = vadd.f32 %v331_v4, %v329_v11  ;;  %v404_v11 = vpop.xlane.xlu1 %403 }
 0x123   :  { %v2482_v18 = vpop.eup %2481  ;;  %v2010_v36 = vrot.slane %v1996_v3, %v5100_v22 }
 0x124   :  { %1814 = vadd.xlane.f32.xlu1 %v1813_v16  ;;  %v2434_v45 = vadd.f32 -0.0001, %v2482_v18  ;;  %335 = vst.msk [vmem:[#allocation2] sm:$0xff] %vm334_vm15, %v332_v14  ;;  %336 = vst.msk [vmem:[#allocation2 + $0x8] sm:$0xff] %vm334_vm15, %v333_v58 }
 0x125   :  { %v4431_v51 = vcombine.low %v5102_v20, %v2010_v36 }
 0x126   :  { %v4389_v5 = vrot.slane %v2434_v45, %v2638_v25  ;;  %v4392_v15 = vrot.slane %v2434_v45, %v2641_v26  ;;  %v4395_v47 = vrot.slane %v2434_v45, %v2647_v29  ;;  %v4398_v21 = vrot.slane %v2434_v45, %v2650_v30 }
 0x127   :  { %v4401_v17 = vrot.slane %v2434_v45, %v2653_v31  ;;  %v4404_v59 = vrot.slane %v2434_v45, %v2656_v32  ;;  %v4407_v27 = vrot.slane %v2434_v45, %v2663_v34  ;;  %v4410_v44 = vrot.slane %v2434_v45, %v2674_v37 }
 0x128   :  { %v1890_v61 = vsub.f32 %v4389_v5, %v2660_v33  ;;  %v1891_v49 = vsub.f32 %v4392_v15, %v2660_v33  ;;  %v1892_v8 = vsub.f32 %v4395_v47, %v2660_v33  ;;  %v1893_v24 = vsub.f32 %v4398_v21, %v2660_v33 }
 0x129   :  { %v1894_v40 = vsub.f32 %v4401_v17, %v2660_v33  ;;  %v1895_v56 = vsub.f32 %v4404_v59, %v2660_v33  ;;  %v1896_v0 = vsub.f32 %v4407_v27, %v2660_v33  ;;  %v1897_v53 = vsub.f32 %v4410_v44, %v2660_v33 }
 0x12a   :  { %v1906_v48 = vand.u32 2147483647, %v1890_v61  ;;  %v1907_v57 = vand.u32 2147483647, %v1891_v49  ;;  %v1908_v39 = vand.u32 2147483647, %v1892_v8  ;;  %v1898_v62 = vsub.f32 %v4389_v5, %v4954_v41 }
 0x12b   :  { %v1909_v1 = vand.u32 2147483647, %v1893_v24  ;;  %v1910_v63 = vand.u32 2147483647, %v1894_v40  ;;  %v1911_v60 = vand.u32 2147483647, %v1895_v56  ;;  %v1899_v46 = vsub.f32 %v4392_v15, %v4954_v41 }
 0x12c   :  { %v1912_v43 = vand.u32 2147483647, %v1896_v0  ;;  %v1913_v10 = vand.u32 2147483647, %v1897_v53  ;;  %v1922_v50 = vsub.f32 0.1, %v1906_v48  ;;  %v1900_v54 = vsub.f32 %v4395_v47, %v4954_v41 }
 0x12d   :  { %v1923_v55 = vsub.f32 0.1, %v1907_v57  ;;  %v1924_v42 = vsub.f32 0.1, %v1908_v39  ;;  %v1925_v12 = vsub.f32 0.1, %v1909_v1  ;;  %v1901_v22 = vsub.f32 %v4398_v21, %v4954_v41 }
 0x12e   :  { %v1926_v28 = vsub.f32 0.1, %v1910_v63  ;;  %v1927_v35 = vsub.f32 0.1, %v1911_v60  ;;  %v1928_v33 = vsub.f32 0.1, %v1912_v43  ;;  %v1902_v13 = vsub.f32 %v4401_v17, %v4954_v41 }
 0x12f   :  { %v1929_v2 = vsub.f32 0.1, %v1913_v10  ;;  %v414_v9 = vld [vmem:[#allocation2] sm:$0xff]  ;;  %v4444_v52 = vmax.f32 %v1922_v50, 0.0  ;;  %v4446_v3 = vmax.f32 %v1923_v55, 0.0  ;;  %v4448_v23 = vmax.f32 %v1924_v42, 0.0  ;;  %v413_v10 = vpop.xlane.xlu1 %412 }
 0x130   :  { %vm2012_vm1 = vcmp.ne.s32.totalorder %v4431_v51, 0  ;;  %v4451_v4 = vmax.f32 %v1925_v12, 0.0  ;;  %v4453_v16 = vmax.f32 %v1926_v28, 0.0  ;;  %v4455_v14 = vmax.f32 %v1927_v35, 0.0  ;;  %v415_v39 = vld [vmem:[#allocation2 + $0x8] sm:$0xff] }
 0x131   :  { %v4457_v58 = vmax.f32 %v1928_v33, 0.0  ;;  %vm2013_vm6 = vmand %vm1954_vm0, %vm2012_vm1  ;;  %v4463_v18 = vmax.f32 %v1929_v2, 0.0  ;;  %v1903_v36 = vsub.f32 %v4404_v59, %v4954_v41  ;;  %v416_v5 = vadd.f32 %v414_v9, %v404_v11 }
 0x132   :  { %v2014_v45 = vsel %vm2013_vm6, 1, %v4964_v38  ;;  %v1904_v8 = vsub.f32 %v4407_v27, %v4954_v41  ;;  %v1914_v24 = vand.u32 2147483647, %v1898_v62  ;;  %v1905_v27 = vsub.f32 %v4410_v44, %v4954_v41  ;;  %vm2096_vm14 = vmand %vm2095_vm10, %vm2012_vm1 }
 0x133   :  { %v2018_v15 = vrot.slane %v2014_v45, %v2638_v25  ;;  %v2022_v47 = vrot.slane %v2014_v45, %v2641_v26  ;;  %v2026_v21 = vrot.slane %v2014_v45, %v2647_v29  ;;  %v2030_v17 = vrot.slane %v2014_v45, %v2650_v30  ;;  %419 = vst.msk [vmem:[#allocation2] sm:$0xff] %vm418_vm2, %v416_v5 }
 0x134   :  { %v2034_v61 = vrot.slane %v2014_v45, %v2653_v31  ;;  %v2038_v49 = vrot.slane %v2014_v45, %v2656_v32  ;;  %v2042_v59 = vrot.slane %v2014_v45, %v2663_v34  ;;  %v1915_v48 = vand.u32 2147483647, %v1899_v46 }
 0x135   :  { %vm4479_vm3 = vcmp.eq.s32.totalorder %v2018_v15, 1  ;;  %vm4483_vm4 = vcmp.eq.s32.totalorder %v2022_v47, 1  ;;  %vm4487_vm5 = vcmp.eq.s32.totalorder %v2026_v21, 1  ;;  %vm4491_vm7 = vcmp.eq.s32.totalorder %v2030_v17, 1 }
 0x136   :  { %v1916_v57 = vand.u32 2147483647, %v1900_v54  ;;  %v2055_v1 = vsel %vm4479_vm3, %v4444_v52, 0.0  ;;  %v2056_v63 = vsel %vm4483_vm4, %v4446_v3, 0.0  ;;  %v1917_v60 = vand.u32 2147483647, %v1901_v22 }
 0x137   :  { %v1918_v43 = vand.u32 2147483647, %v1902_v13  ;;  %v2046_v50 = vrot.slane %v2014_v45, %v2674_v37  ;;  %vm4504_vm8 = vcmp.eq.s32.totalorder %v2034_v61, 1  ;;  %vm4508_vm9 = vcmp.eq.s32.totalorder %v2038_v49, 1 }
 0x138   :  { %v2057_v44 = vsel %vm4487_vm5, %v4448_v23, 0.0  ;;  %vm4515_vm12 = vcmp.eq.s32.totalorder %v2042_v59, 1  ;;  %v2058_v12 = vsel %vm4491_vm7, %v4451_v4, 0.0  ;;  %v2071_v20 = vadd.f32 %v2056_v63, %v2055_v1 }
 0x139   :  { %v1919_v28 = vand.u32 2147483647, %v1903_v36  ;;  %v1930_v35 = vsub.f32 0.1, %v1914_v24  ;;  %v1931_v33 = vsub.f32 0.1, %v1915_v48  ;;  %v417_v62 = vadd.f32 %v415_v39, %v413_v10 }
 0x13a   :  { %v1932_v2 = vsub.f32 0.1, %v1916_v57  ;;  %v2059_v46 = vsel %vm4504_vm8, %v4453_v16, 0.0  ;;  %v2072_v54 = vadd.f32 %v2071_v20, %v2057_v44  ;;  %v1920_v22 = vand.u32 2147483647, %v1904_v8 }
 0x13b   :  { %v1933_v13 = vsub.f32 0.1, %v1917_v60  ;;  %v1921_v11 = vand.u32 2147483647, %v1905_v27  ;;  %v1934_v9 = vsub.f32 0.1, %v1918_v43 }
 0x13c   :  { %v4525_v45 = vmax.f32 %v1930_v35, 0.0  ;;  %v4527_v5 = vmax.f32 %v1931_v33, 0.0  ;;  %420 = vst.msk [vmem:[#allocation2 + $0x8] sm:$0xff] %vm418_vm2, %v417_v62  ;;  %vm4530_vm11 = vcmp.eq.s32.totalorder %v2046_v50, 1  ;;  %v2073_v15 = vadd.f32 %v2072_v54, %v2058_v12 }
 0x13d   :  { %v1935_v47 = vsub.f32 0.1, %v1919_v28  ;;  %v4534_v21 = vmax.f32 %v1932_v2, 0.0  ;;  %v2060_v17 = vsel %vm4508_vm9, %v4455_v14, 0.0  ;;  %v4539_v61 = vmax.f32 %v1933_v13, 0.0 }
 0x13e   :  { %v2063_v49 = vsel %vm4479_vm3, %v4525_v45, 0.0  ;;  %vm2178_vm0 = vcmp.eq.s32.totalorder %v4428_v6, 2  ;;  %v2061_v8 = vsel %vm4515_vm12, %v4457_v58, 0.0  ;;  %v2074_v24 = vadd.f32 %v2073_v15, %v2059_v46 }
 0x13f   :  { %v1936_v59 = vsub.f32 0.1, %v1920_v22  ;;  %v2064_v27 = vsel %vm4483_vm4, %v4527_v5, 0.0  ;;  %v2062_v40 = vsel %vm4530_vm11, %v4463_v18, 0.0  ;;  %v1937_v48 = vsub.f32 0.1, %v1921_v11  ;;  %vm2179_vm4 = vmand %vm2178_vm0, %vm2012_vm1 }
 0x140   :  { %v4558_v57 = vmax.f32 %v1934_v9, 0.0  ;;  %v2065_v39 = vsel %vm4487_vm5, %v4534_v21, 0.0  ;;  %v2075_v1 = vadd.f32 %v2074_v24, %v2060_v17  ;;  %v4563_v63 = vmax.f32 %v1935_v47, 0.0 }
 0x141   :  { %v2080_v60 = vadd.f32 %v2064_v27, %v2063_v49  ;;  %v2097_v43 = vsel %vm2096_vm14, 1, %v4964_v38  ;;  %v2066_v56 = vsel %vm4491_vm7, %v4539_v61, 0.0  ;;  %v4572_v20 = vmax.f32 %v1936_v59, 0.0 }
 0x142   :  { %v2101_v10 = vrot.slane %v2097_v43, %v2638_v25  ;;  %v2105_v50 = vrot.slane %v2097_v43, %v2641_v26  ;;  %v2109_v44 = vrot.slane %v2097_v43, %v2647_v29  ;;  %v2076_v12 = vadd.f32 %v2075_v1, %v2061_v8 }
 0x143   :  { %v2081_v0 = vadd.f32 %v2080_v60, %v2065_v39  ;;  %v2113_v28 = vrot.slane %v2097_v43, %v2650_v30  ;;  %v4575_v35 = vmax.f32 %v1937_v48, 0.0  ;;  %v2067_v33 = vsel %vm4504_vm8, %v4558_v57, 0.0 }
 0x144   :  { %vm4580_vm6 = vcmp.eq.s32.totalorder %v2101_v10, 1  ;;  %vm4584_vm10 = vcmp.eq.s32.totalorder %v2105_v50, 1  ;;  %v2077_v62 = vadd.f32 %v2076_v12, %v2062_v40  ;;  %v2117_v54 = vrot.slane %v2097_v43, %v2653_v31  ;;  %v488_v40 = vpop.xlane.xlu0 %487 }
 0x145   :  { %v2082_v46 = vadd.f32 %v2081_v0, %v2066_v56  ;;  %vm4589_vm3 = vcmp.eq.s32.totalorder %v2109_v44, 1  ;;  %v2068_v55 = vsel %vm4508_vm9, %v4563_v63, 0.0  ;;  %v2121_v13 = vrot.slane %v2097_v43, %v2656_v32 }
 0x146   :  { %v2125_v11 = vrot.slane %v2097_v43, %v2663_v34  ;;  %v2129_v9 = vrot.slane %v2097_v43, %v2674_v37  ;;  %2078 = vadd.xlane.f32.xlu0 %v2077_v62  ;;  %vm4603_vm5 = vcmp.eq.s32.totalorder %v2113_v28, 1  ;;  %v2138_v6 = vsel %vm4580_vm6, %v4444_v52, 0.0 }
 0x147   :  { %v2083_v15 = vadd.f32 %v2082_v46, %v2067_v33  ;;  %v2139_v51 = vsel %vm4584_vm10, %v4446_v3, 0.0  ;;  %v2069_v41 = vsel %vm4515_vm12, %v4572_v20, 0.0  ;;  %v2070_v17 = vsel %vm4530_vm11, %v4575_v35, 0.0 }
 0x148   :  { %v2140_v49 = vsel %vm4589_vm3, %v4448_v23, 0.0  ;;  %v4623_v8 = vsel %vm2179_vm4, 1, %v4964_v38  ;;  %vm4625_vm1 = vcmp.eq.s32.totalorder %v2117_v54, 1  ;;  %v2154_v27 = vadd.f32 %v2139_v51, %v2138_v6 }
 0x149   :  { %v2084_v24 = vadd.f32 %v2083_v15, %v2068_v55  ;;  %v2146_v42 = vsel %vm4580_vm6, %v4525_v45, 0.0  ;;  %vm4632_vm7 = vcmp.eq.s32.totalorder %v2121_v13, 1  ;;  %vm4636_vm8 = vcmp.eq.s32.totalorder %v2125_v11, 1 }
 0x14a   :  { %v2141_v38 = vsel %vm4603_vm5, %v4451_v4, 0.0  ;;  %v2147_v48 = vsel %vm4584_vm10, %v4527_v5, 0.0  ;;  %vm4646_vm9 = vcmp.eq.s32.totalorder %v2129_v9, 1  ;;  %v2155_v60 = vadd.f32 %v2154_v27, %v2140_v49 }
 0x14b   :  { %v2085_v39 = vadd.f32 %v2084_v24, %v2069_v41  ;;  %v2148_v43 = vsel %vm4589_vm3, %v4534_v21, 0.0  ;;  %v2142_v56 = vsel %vm4625_vm1, %v4453_v16, 0.0  ;;  %v2163_v10 = vadd.f32 %v2147_v48, %v2146_v42 }
 0x14c   :  { %v2184_v50 = vrot.slane %v4623_v8, %v2638_v25  ;;  %v2188_v44 = vrot.slane %v4623_v8, %v2641_v26  ;;  %v2156_v0 = vadd.f32 %v2155_v60, %v2141_v38  ;;  %v2149_v28 = vsel %vm4603_vm5, %v4539_v61, 0.0  ;;  %v499_v38 = vld [vmem:[#allocation2 + $0x8] sm:$0xff] }
 0x14d   :  { %v2086_v12 = vadd.f32 %v2085_v39, %v2070_v17  ;;  %v2192_v33 = vrot.slane %v4623_v8, %v2647_v29  ;;  %v2143_v53 = vsel %vm4632_vm7, %v4455_v14, 0.0  ;;  %v2144_v25 = vsel %vm4636_vm8, %v4457_v58, 0.0 }
 0x14e   :  { %v2164_v2 = vadd.f32 %v2163_v10, %v2148_v43  ;;  %v2196_v26 = vrot.slane %v4623_v8, %v2650_v30  ;;  %v2157_v62 = vadd.f32 %v2156_v0, %v2142_v56  ;;  %v2150_v46 = vsel %vm4625_vm1, %v4558_v57, 0.0 }
 0x14f   :  { %2087 = vadd.xlane.f32.xlu1 %v2086_v12  ;;  %vm4676_vm12 = vcmp.eq.s32.totalorder %v2184_v50, 1  ;;  %vm4680_vm11 = vcmp.eq.s32.totalorder %v2188_v44, 1  ;;  %vm502_vm14 = vcmask 23568   ;;  %v2145_v22 = vsel %vm4646_vm9, %v4463_v18, 0.0 }
 0x150   :  { %v2165_v30 = vadd.f32 %v2164_v2, %v2149_v28  ;;  %v2200_v55 = vrot.slane %v4623_v8, %v2653_v31  ;;  %vm4689_vm0 = vcmp.eq.s32.totalorder %v2192_v33, 1  ;;  %v2158_v11 = vadd.f32 %v2157_v62, %v2143_v53 }
 0x151   :  { %v2151_v9 = vsel %vm4632_vm7, %v4563_v63, 0.0  ;;  %v2152_v15 = vsel %vm4636_vm8, %v4572_v20, 0.0  ;;  %v2204_v47 = vrot.slane %v4623_v8, %v2656_v32  ;;  %vm4701_vm6 = vcmp.eq.s32.totalorder %v2196_v26, 1 }
 0x152   :  { %v2166_v6 = vadd.f32 %v2165_v30, %v2150_v46  ;;  %v2221_v31 = vsel %vm4676_vm12, %v4444_v52, 0.0  ;;  %v2222_v41 = vsel %vm4680_vm11, %v4446_v3, 0.0  ;;  %v2159_v17 = vadd.f32 %v2158_v11, %v2144_v25  ;;  %v762_v46 = vpop.xlane.xlu0 %761 }
 0x153   :  { %v2153_v49 = vsel %vm4646_vm9, %v4575_v35, 0.0  ;;  %v2208_v32 = vrot.slane %v4623_v8, %v2663_v34  ;;  %v2223_v24 = vsel %vm4689_vm0, %v4448_v23, 0.0  ;;  %v2212_v52 = vrot.slane %v4623_v8, %v2674_v37  ;;  %v498_v37 = vld [vmem:[#allocation2] sm:$0xff]  ;;  %v497_v8 = vpop.xlane.xlu1 %496 }
 0x154   :  { %v2167_v59 = vadd.f32 %v2166_v6, %v2151_v9  ;;  %vm4721_vm10 = vcmp.eq.s32.totalorder %v2200_v55, 1  ;;  %v2237_v3 = vadd.f32 %v2222_v41, %v2221_v31  ;;  %v2160_v42 = vadd.f32 %v2159_v17, %v2145_v22 }
 0x155   :  { %v2224_v36 = vsel %vm4701_vm6, %v4451_v4, 0.0  ;;  %v2229_v34 = vsel %vm4676_vm12, %v4525_v45, 0.0  ;;  %v2230_v23 = vsel %vm4680_vm11, %v4527_v5, 0.0  ;;  %vm4734_vm3 = vcmp.eq.s32.totalorder %v2204_v47, 1 }
 0x156   :  { %v2168_v48 = vadd.f32 %v2167_v59, %v2152_v15  ;;  %v2238_v1 = vadd.f32 %v2237_v3, %v2223_v24  ;;  %v2231_v4 = vsel %vm4689_vm0, %v4534_v21, 0.0  ;;  %2161 = vadd.xlane.f32.xlu0 %v2160_v42  ;;  %vm4741_vm4 = vcmp.eq.s32.totalorder %v2208_v32, 1 }
 0x157   :  { %v2225_v5 = vsel %vm4721_vm10, %v4453_v16, 0.0  ;;  %v2232_v60 = vsel %vm4701_vm6, %v4539_v61, 0.0  ;;  %v2246_v43 = vadd.f32 %v2230_v23, %v2229_v34  ;;  %v500_v50 = vadd.f32 %v498_v37, %v488_v40  ;;  %v771_v29 = vpop.xlane.xlu1 %770 }
 0x158   :  { %v2169_v56 = vadd.f32 %v2168_v48, %v2153_v49  ;;  %v2239_v10 = vadd.f32 %v2238_v1, %v2224_v36  ;;  %v501_v44 = vadd.f32 %v499_v38, %v497_v8  ;;  %v2226_v21 = vsel %vm4734_vm3, %v4455_v14, 0.0 }
 0x159   :  { %v2247_v12 = vadd.f32 %v2246_v43, %v2231_v4  ;;  %vm4754_vm5 = vcmp.eq.s32.totalorder %v2212_v52, 1  ;;  %v2233_v61 = vsel %vm4721_vm10, %v4558_v57, 0.0  ;;  %503 = vst.msk [vmem:[#allocation2] sm:$0xff] %vm502_vm14, %v500_v50  ;;  %v2227_v28 = vsel %vm4741_vm4, %v4457_v58, 0.0  ;;  %v5151_v43 = vld [vmem:[#allocation12_spill] sm:$0xff] }
 0x15a   :  { %2170 = vadd.xlane.f32.xlu1 %v2169_v56  ;;  %v2240_v16 = vadd.f32 %v2239_v10, %v2225_v5  ;;  %504 = vst.msk [vmem:[#allocation2 + $0x8] sm:$0xff] %vm502_vm14, %v501_v44  ;;  %v2234_v53 = vsel %vm4734_vm3, %v4563_v63, 0.0  ;;  %v2228_v25 = vsel %vm4754_vm5, %v4463_v18, 0.0  ;;  %v2235_v26 = vsel %vm4741_vm4, %v4572_v20, 0.0  ;;  %v845_v20 = vpop.xlane.xlu0 %844 }
 0x15b   :  { %v2248_v14 = vadd.f32 %v2247_v12, %v2232_v60  ;;  %v2236_v54 = vsel %vm4754_vm5, %v4575_v35, 0.0  ;;  %v854_v11 = vpop.xlane.xlu1 %853  ;;  %vm2283_vm1 = vcmp.le.s32.totalorder %v3944_v7, %v5151_v43  ;;  %vm2289_vm7 = vcmask 130048  }
 0x15c   :  { %v2241_v33 = vadd.f32 %v2240_v16, %v2226_v21  ;;  %v2435_v10 = vsel %vm2283_vm1, 1.0, %v2562_v19  ;;  %vm2371_vm9 = vcmp.lt.s32.totalorder %v3944_v7, 3 }
 0x15d   :  { %v2249_v2 = vadd.f32 %v2248_v14, %v2233_v61  ;;  %2447 = vmatprep.mubr.msk.f32.mxu0 %vm2289_vm7, %v2435_v10 }
 0x15e   :  { %v2242_v57 = vadd.f32 %v2241_v33, %v2227_v28  ;;  %v928_v35 = vpop.xlane.xlu0 %927 }
 0x15f   :  { %v2250_v62 = vadd.f32 %v2249_v2, %v2234_v53  ;;  %v937_v51 = vpop.xlane.xlu1 %936 }
 0x160   :  { %v2243_v58 = vadd.f32 %v2242_v57, %v2228_v25  ;;  %v772_v63 = vld [vmem:[#allocation2] sm:$0xff] }
 0x161   :  { %v2251_v22 = vadd.f32 %v2250_v62, %v2235_v26  ;;  %v773_v30 = vld [vmem:[#allocation2 + $0x8] sm:$0xff]  ;;  %v774_v55 = vadd.f32 %v772_v63, %v762_v46 }
 0x162   :  { %2244 = vadd.xlane.f32.xlu0 %v2243_v58  ;;  %v775_v18 = vadd.f32 %v773_v30, %v771_v29  ;;  %v1201_v32 = vpop.xlane.xlu0 %1200 }
 0x163   :  { %v2252_v13 = vadd.f32 %v2251_v22, %v2236_v54  ;;  %776 = vst.msk [vmem:[#allocation2] sm:$0xff] %vm334_vm15, %v774_v55 }
 0x164   :  { %777 = vst.msk [vmem:[#allocation2 + $0x8] sm:$0xff] %vm334_vm15, %v775_v18 }
 0x165   :  { %2253 = vadd.xlane.f32.xlu1 %v2252_v13 }
 0x167   :  { %v1210_v24 = vpop.xlane.xlu1 %1209 }
 0x16a   :  { %v855_v9 = vld [vmem:[#allocation2] sm:$0xff]  ;;  %v1284_v42 = vpop.xlane.xlu0 %1283 }
 0x16b   :  { %v856_v15 = vld [vmem:[#allocation2 + $0x8] sm:$0xff]  ;;  %v857_v47 = vadd.f32 %v855_v9, %v845_v20 }
 0x16c   :  { %v858_v6 = vadd.f32 %v856_v15, %v854_v11 }
 0x16d   :  { %859 = vst.msk [vmem:[#allocation2] sm:$0xff] %vm418_vm2, %v857_v47  ;;  %v1293_v36 = vpop.xlane.xlu1 %1292 }
 0x16e   :  { %860 = vst.msk [vmem:[#allocation2 + $0x8] sm:$0xff] %vm418_vm2, %v858_v6 }
 0x174   :  { %v938_v31 = vld [vmem:[#allocation2] sm:$0xff] }
 0x175   :  { %v939_v41 = vld [vmem:[#allocation2 + $0x8] sm:$0xff]  ;;  %v940_v17 = vadd.f32 %v938_v31, %v928_v35 }
 0x176   :  { %v941_v49 = vadd.f32 %v939_v41, %v937_v51  ;;  %v1367_v8 = vpop.xlane.xlu0 %1366  ;;  %v5152_v51 = vld [vmem:[#allocation16_spill] sm:$0xff] }
 0x177   :  { %942 = vst.msk [vmem:[#allocation2] sm:$0xff] %vm502_vm14, %v940_v17  ;;  %vm5153_vm8 = vcmp.lt.s32.totalorder %v5152_v51, 10  ;;  %vm2389_vm12 = vcmp.lt.s32.totalorder %v5152_v51, 9 }
 0x178   :  { %943 = vst.msk [vmem:[#allocation2 + $0x8] sm:$0xff] %vm502_vm14, %v941_v49  ;;  %v1376_v38 = vpop.xlane.xlu1 %1375  ;;  %v2267_v31 = vsel %vm5153_vm8, 0.0001, %v2562_v19 }
 0x17e   :  { %v1211_v59 = vld [vmem:[#allocation2] sm:$0xff] }
 0x17f   :  { %v1212_v52 = vld [vmem:[#allocation2 + $0x8] sm:$0xff]  ;;  %v1213_v27 = vadd.f32 %v1211_v59, %v1201_v32 }
 0x180   :  { %v1214_v3 = vadd.f32 %v1212_v52, %v1210_v24 }
 0x181   :  { %1215 = vst.msk [vmem:[#allocation2] sm:$0xff] %vm334_vm15, %v1213_v27 }
 0x182   :  { %1216 = vst.msk [vmem:[#allocation2 + $0x8] sm:$0xff] %vm334_vm15, %v1214_v3 }
 0x188   :  { %v1294_v34 = vld [vmem:[#allocation2] sm:$0xff] }
 0x189   :  { %v1295_v23 = vld [vmem:[#allocation2 + $0x8] sm:$0xff]  ;;  %v1296_v40 = vadd.f32 %v1294_v34, %v1284_v42 }
 0x18a   :  { %v1297_v37 = vadd.f32 %v1295_v23, %v1293_v36 }
 0x18b   :  { %1298 = vst.msk [vmem:[#allocation2] sm:$0xff] %vm418_vm2, %v1296_v40 }
 0x18c   :  { %1299 = vst.msk [vmem:[#allocation2 + $0x8] sm:$0xff] %vm418_vm2, %v1297_v37 }
 0x192   :  { %v1377_v48 = vld [vmem:[#allocation2] sm:$0xff] }
 0x193   :  { %v1378_v39 = vld [vmem:[#allocation2 + $0x8] sm:$0xff]  ;;  %v1379_v1 = vadd.f32 %v1377_v48, %v1367_v8 }
 0x194   :  { %v1380_v4 = vadd.f32 %v1378_v39, %v1376_v38 }
 0x195   :  { %1381 = vst.msk [vmem:[#allocation2] sm:$0xff] %vm502_vm14, %v1379_v1 }
 0x196   :  { %1382 = vst.msk [vmem:[#allocation2 + $0x8] sm:$0xff] %vm502_vm14, %v1380_v4  ;;  %v1640_v45 = vpop.xlane.xlu0 %1639 }
 0x19c   :  { %v1650_v5 = vld [vmem:[#allocation2] sm:$0xff] }
 0x19d   :  { %v1652_v60 = vadd.f32 %v1650_v5, %v1640_v45  ;;  %v1651_v56 = vld [vmem:[#allocation2 + $0x8] sm:$0xff] }
 0x19f   :  { %1654 = vst.msk [vmem:[#allocation2] sm:$0xff] %vm334_vm15, %v1652_v60 }
 0x1a1   :  { %v1649_v50 = vpop.xlane.xlu1 %1648 }
 0x1a2   :  { %v1653_v44 = vadd.f32 %v1651_v56, %v1649_v50 }
 0x1a3   :  { %v1723_v21 = vpop.xlane.xlu0 %1722 }
 0x1a4   :  { %1655 = vst.msk [vmem:[#allocation2 + $0x8] sm:$0xff] %vm334_vm15, %v1653_v44 }
 0x1a6   :  { %v1733_v12 = vld [vmem:[#allocation2] sm:$0xff]  ;;  %v1732_v16 = vpop.xlane.xlu1 %1731 }
 0x1a7   :  { %v1735_v0 = vadd.f32 %v1733_v12, %v1723_v21 }
 0x1a9   :  { %1737 = vst.msk [vmem:[#allocation2] sm:$0xff] %vm418_vm2, %v1735_v0 }
 0x1ab   :  { %v1734_v61 = vld [vmem:[#allocation2 + $0x8] sm:$0xff] }
 0x1ac   :  { %v1736_v28 = vadd.f32 %v1734_v61, %v1732_v16 }
 0x1ae   :  { %1738 = vst.msk [vmem:[#allocation2 + $0x8] sm:$0xff] %vm418_vm2, %v1736_v28  ;;  %v1806_v14 = vpop.xlane.xlu0 %1805 }
 0x1b0   :  { %v1816_v33 = vld [vmem:[#allocation2] sm:$0xff] }
 0x1b1   :  { %v1818_v53 = vadd.f32 %v1816_v33, %v1806_v14  ;;  %v1815_v25 = vpop.xlane.xlu1 %1814 }
 0x1b3   :  { %1820 = vst.msk [vmem:[#allocation2] sm:$0xff] %vm502_vm14, %v1818_v53 }
 0x1b5   :  { %v1817_v2 = vld [vmem:[#allocation2 + $0x8] sm:$0xff] }
 0x1b6   :  { %v1819_v57 = vadd.f32 %v1817_v2, %v1815_v25 }
 0x1b8   :  { %1821 = vst.msk [vmem:[#allocation2 + $0x8] sm:$0xff] %vm502_vm14, %v1819_v57 }
 0x1ba   :  { %v2089_v26 = vld [vmem:[#allocation2] sm:$0xff] }
 0x1bf   :  { %v2090_v29 = vld [vmem:[#allocation2 + $0x8] sm:$0xff] }
 0x1d3   :  { %v2079_v62 = vpop.xlane.xlu0 %2078 }
 0x1d4   :  { %v2091_v46 = vadd.f32 %v2089_v26, %v2079_v62 }
 0x1d6   :  { %2093 = vst.msk [vmem:[#allocation2] sm:$0xff] %vm334_vm15, %v2091_v46 }
 0x1dc   :  { %v2088_v58 = vpop.xlane.xlu1 %2087 }
 0x1dd   :  { %v2092_v54 = vadd.f32 %v2090_v29, %v2088_v58  ;;  %v2172_v22 = vld [vmem:[#allocation2] sm:$0xff] }
 0x1df   :  { %2094 = vst.msk [vmem:[#allocation2 + $0x8] sm:$0xff] %vm334_vm15, %v2092_v54 }
 0x1e3   :  { %v2162_v63 = vpop.xlane.xlu0 %2161 }
 0x1e4   :  { %v2174_v30 = vadd.f32 %v2172_v22, %v2162_v63 }
 0x1e6   :  { %v2173_v55 = vld [vmem:[#allocation2 + $0x8] sm:$0xff]  ;;  %2176 = vst.msk [vmem:[#allocation2] sm:$0xff] %vm418_vm2, %v2174_v30 }
 0x1e7   :  { %v2171_v18 = vpop.xlane.xlu1 %2170 }
 0x1e8   :  { %v2175_v13 = vadd.f32 %v2173_v55, %v2171_v18 }
 0x1ea   :  { %2177 = vst.msk [vmem:[#allocation2 + $0x8] sm:$0xff] %vm418_vm2, %v2175_v13  ;;  %vm2284_vm2 = vcmp.le.s32.totalorder %v3944_v7, %v5152_v51 }
 0x1eb   :  { %v2436_v38 = vsel %vm2284_vm2, 1.0, %v2562_v19 }
 0x1ed   :  { %v2255_v20 = vld [vmem:[#allocation2] sm:$0xff] }
 0x1ef   :  { %v2245_v11 = vpop.xlane.xlu0 %2244 }
 0x1f0   :  { %v2257_v9 = vadd.f32 %v2255_v20, %v2245_v11 }
 0x1f1   :  { %v2256_v15 = vld [vmem:[#allocation2 + $0x8] sm:$0xff] }
 0x1f2   :  { %2259 = vst.msk [vmem:[#allocation2] sm:$0xff] %vm502_vm14, %v2257_v9  ;;  %v2254_v47 = vpop.xlane.xlu1 %2253 }
 0x1f3   :  { %v2258_v6 = vadd.f32 %v2256_v15, %v2254_v47 }
 0x1f5   :  { %2260 = vst.msk [vmem:[#allocation2 + $0x8] sm:$0xff] %vm502_vm14, %v2258_v6 }
 0x1f9   :  { %v2264_v35 = vld [vmem:[#allocation2] sm:$0xff] }
 0x1fa   :  { %v2268_v41 = vadd.f32 0.0001, %v2264_v35 }
 0x1fc   :  { %v2265_v17 = vld [vmem:[#allocation2 + $0x8] sm:$0xff]  ;;  %v2271_v32 = vsel %vm40_vm13, %v2268_v41, 0.0 }
 0x1fd   :  { %v2269_v49 = vadd.f32 %v2267_v31, %v2265_v17 }
 0x1ff   :  { %v2272_v24 = vsel %vm40_vm13, %v2269_v49, 0.0 }
 0x200   :  { %v2273_v59 = vadd.f32 %v2272_v24, %v2271_v32 }
 0x202   :  { %v2274_v52 = vrot.slane %v2273_v59, 4 }
 0x204   :  { %v2275_v27 = vadd.f32 %v2274_v52, %v2273_v59 }
 0x206   :  { %v2276_v3 = vrot.slane %v2275_v27, 2 }
 0x208   :  { %v2277_v42 = vadd.f32 %v2276_v3, %v2275_v27 }
 0x20a   :  { %v2278_v36 = vrot.slane %v2277_v42, 1 }
 0x20c   :  { %v2279_v34 = vadd.f32 %v2278_v36, %v2277_v42 }
 0x20e   :  { %2483 = vrcp.f32 %v2279_v34 }
 0x218   :  { %v2484_v23 = vpop.eup %2483 }
 0x219   :  { %v2281_v40 = vmul.f32 %v2484_v23, %v2268_v41  ;;  %v2282_v37 = vmul.f32 %v2484_v23, %v2269_v49 }
 0x21b   :  { %v2450_v8 = vpack.c.bf16 %v2282_v37, %v2281_v40 }
 0x21d   :  { %2451 = vmatprep.subr.bf16.mxu0 %v2450_v8 }
 0x21e   :  { %2453 = vmatpush3.bf16.msra.mxu0 %v2450_v8 }
 0x221   :  { %2448 = vmatmul.mubr.msk.f32.vlgmr.msra.gmra.mrb[0].mxu0 %vm2289_vm7, %v2436_v38 }
 0x2f4   :  { %v2449_v48 = vpop.f32.mrb[0].mxu0 }
 0x2f5   :  { %v2362_v39 = vpop.f32.mrb[1].mxu0  ;;  %v2381_v1 = vsel %vm2371_vm9, %v2449_v48, inf  ;;  %v2373_v4 = vsel %vm2371_vm9, %v2449_v48, -inf }
 0x2f6   :  { %v2385_v45 = vsel %vm40_vm13, %v2381_v1, inf  ;;  %v2377_v5 = vsel %vm40_vm13, %v2373_v4, -inf  ;;  %v2372_v60 = vsel %vm2371_vm9, %v2362_v39, -inf  ;;  %v2380_v43 = vsel %vm2371_vm9, %v2362_v39, inf }
 0x2f7   :  { %2386 = vmin.xlane.f32.xlu1 %v2385_v45  ;;  %2378 = vmax.xlane.f32.xlu0 %v2377_v5  ;;  %v2382_v56 = vsel %vm40_vm13, %v2380_v43, inf  ;;  %v2374_v19 = vsel %vm40_vm13, %v2372_v60, -inf  ;;  %vm2407_vm13 = vcmask 0  }
 0x2fb   :  { %2383 = vmin.xlane.f32.xlu1 %v2382_v56  ;;  %2375 = vmax.xlane.f32.xlu0 %v2374_v19 }
 0x384   :  { %v2387_v10 = vpop.xlane.xlu1 %2386  ;;  %v2379_v7 = vpop.xlane.xlu0 %2378 }
 0x385   :  { %v2391_v50 = vsub.f32 %v2379_v7, %v2387_v10 }
 0x387   :  { %v2393_v44 = vsel %vm2389_vm12, %v2391_v50, 0.0 }
 0x388   :  { %v2384_v21 = vpop.xlane.xlu1 %2383  ;;  %v2376_v12 = vpop.xlane.xlu0 %2375  ;;  %v2395_v61 = vsel %vm334_vm15, %v2393_v44, 0.0 }
 0x389   :  { %v2390_v0 = vsub.f32 %v2376_v12, %v2384_v21 }
 0x38b   :  { %v2394_v16 = vsel %vm334_vm15, %v2390_v0, 0.0 }
 0x38c   :  { %v2396_v28 = vadd.f32 %v2395_v61, %v2394_v16 }
 0x38e   :  { %2397 = vadd.xlane.f32.xlu0 %v2396_v28 }
 0x41b   :  { %v2398_v14 = vpop.xlane.xlu0 %2397 }
 0x41c   :  { %v2399_v33 = vrot.slane %v2398_v14, 4 }
 0x41e   :  { %v2400_v53 = vadd.f32 %v2399_v33, %v2398_v14 }
 0x420   :  { %v2401_v25 = vrot.slane %v2400_v53, 2 }
 0x422   :  { %v2402_v2 = vadd.f32 %v2401_v25, %v2400_v53 }
 0x424   :  { %v2403_v57 = vrot.slane %v2402_v2, 1 }
 0x426   :  { %v2404_v26 = vadd.f32 %v2403_v57, %v2402_v2 }
 0x428   :  { %2454 = vpush %v2404_v26 }
 0x459   :  { %s2455_s5 = spop %2454 }
 0x45a   :  { %v2406_v62 = vstv %s2455_s5 }
 0x45b   :  { %2408 = vst.msk [vmem:[#allocation8] sm:$0x1] %vm2407_vm13, %v2406_v62 }
 0x45c   :  { %2540 = shalt.err (!%p2537_p6)
}
 0x45d   :  { %s2541_s10 = scalar_lea.hbm %s4837_s2, 16 }
 0x45e   :  { %p2542_p7 = scmp.ne.s32.totalorder %s4837_s2, %s2541_s10  ;;  %p2545_p8 = scmp.lt.u32.totalorder %s2541_s10, %s4837_s2 }
 0x460   :  { %p2547_p9 = pnand %p2545_p8, %p2542_p7 }
 0x462   :  { %2550 = shalt.err (!%p2547_p9)
}
 0x463   :  { %2418 = dma.vmem_to_hbm [thread:$0]  %s2416_s4, 16, %s4837_s2, [#allocation5]  }
 0x464   :  { %2555 = dma.done.wait [#allocation5], 16  }
 0x465   :  { %2556 = vsyncadd [#allocation5], 4294967280 }
 0x466   :  { %2422 = vsyncpa [#allocation4], 1 }
 0x467   :  { %2423 = vsyncpa [#allocation7], 1 }
 0x468   :  { %2424 = vsyncpa [#allocation5], 1 }

</bundles_post_ra>
